<compile_context>
chip_gen: v7x
topology: tpu7x:2x2x1
jax: 0.10.0
libtpu: 0.0.40
codegen_flags: <defaults>
</compile_context>

<pallas_src>
import jax
import jax.numpy as jnp
from jax import lax
from jax.experimental import pallas as pl
from jax.experimental.pallas import tpu as pltpu


def _round_up(x, m):
    return ((x + m - 1) // m) * m


def _vmem_estimate(bb, hp, wp, cin, ho, wo, cp, m1, k2):
    """Rough per-grid-step VMEM footprint in bytes (pipelined blocks + scratches + temps)."""
    mt = bb * m1
    in_blk = bb * hp * wp * cin * 4 * 2             # f32 input block x2 pipeline buffers
    out_blk = bb * ho * wo * cp * 2 * 2             # bf16 output block x2
    out1 = bb * (ho + 2) * (wo + 2) * cp * 2        # relu(conv1) halo scratch (bf16)
    im2 = mt * _round_up(k2, 128) * 2               # conv2 im2col scratch (lane padded)
    tmp = mt * cp * 4 * 3                           # f32 accumulators / relu temporaries
    wts = (9 * cin * cp + k2 * cp) * 2 * 2          # resident bf16 weights (x2 safety)
    return in_blk + out_blk + out1 + im2 + tmp + wts


def _pick_batch_block(n, hp, wp, cin, ho, wo, cp, m1, k2,
                      budget=16 * 1024 * 1024, m_cap=4096):
    """Largest divisor of n that keeps >=2 (ideally >=4) grid steps and fits VMEM."""
    min_steps = 4 if n >= 4 else (2 if n >= 2 else 1)
    best = 1
    for bb in range(1, n + 1):
        if n % bb:
            continue
        if n // bb < min_steps:
            continue
        if bb * m1 > m_cap:
            continue
        if _vmem_estimate(bb, hp, wp, cin, ho, wo, cp, m1, k2) > budget:
            continue
        best = bb
    return best


def _make_basic_block_kernel(bb, ho, wo, cin, cp, stride, compute_dtype):
    """Fused conv1(3x3,s)+ReLU -> conv2(3x3,1)+shortcut -> ReLU for a block of BB images."""
    m1 = ho * wo
    mt = bb * m1
    k2 = 9 * cp + cin  # conv2 taps stacked along K + shortcut K-slot

    def sds(start, size):
        if stride == 1:
            return pl.ds(start, size)
        return pl.ds(start, size, stride=stride)

    def kernel(x_ref, w1_ref, w2s_ref, o_ref, out1_ref, im2_ref):
        # x_ref    : (BB, H+2, W+2, Cin)   zero-padded input images (f32)
        # w1_ref   : (9, Cin, Cp)          conv1 taps, Cout padded to Cp (bf16)
        # w2s_ref  : (9*Cp+Cin, Cp)        conv2 taps stacked along K + shortcut rows (bf16)
        # o_ref    : (BB, Ho, Wo, Cp)      lane-dense output block (bf16)
        # out1_ref : (BB, Ho+2, Wo+2, Cp)  relu(conv1) with 1-px zero halo (bf16 scratch)
        # im2_ref  : (BB*Ho*Wo, 9*Cp+Cin)  conv2 im2col + shortcut slot (bf16 scratch)

        # ---- zero only the 1-px halo ring (interior is fully overwritten each step) -----
        zrow = jnp.zeros((bb, 1, wo + 2, cp), compute_dtype)
        zcol = jnp.zeros((bb, ho + 2, 1, cp), compute_dtype)
        out1_ref[:, pl.ds(0, 1), :, :] = zrow
        out1_ref[:, pl.ds(ho + 1, 1), :, :] = zrow
        out1_ref[:, :, pl.ds(0, 1), :] = zcol
        out1_ref[:, :, pl.ds(wo + 1, 1), :] = zcol

        # ---- conv1 (3x3, stride s, pad 1) + ReLU, result stays in VMEM ------------------
        acc1 = jnp.zeros((mt, cp), jnp.float32)
        for kh in range(3):
            for kw in range(3):
                patch = x_ref[:, sds(kh, ho), sds(kw, wo), :]          # (BB, Ho, Wo, Cin)
                patch = patch.reshape(mt, cin).astype(compute_dtype)
                acc1 = acc1 + jnp.dot(patch, w1_ref[kh * 3 + kw],
                                      preferred_element_type=jnp.float32)
        out1_ref[:, pl.ds(1, ho), pl.ds(1, wo), :] = (
            jnp.maximum(acc1, 0.0).astype(compute_dtype).reshape(bb, ho, wo, cp))

        # ---- conv2 (3x3, s=1, pad 1) + shortcut as ONE K-stacked MXU matmul -------------
        for kh in range(3):
            for kw in range(3):
                t = kh * 3 + kw
                o1 = out1_ref[:, pl.ds(kh, ho), pl.ds(kw, wo), :]      # (BB, Ho, Wo, Cp)
                im2_ref[:, pl.ds(t * cp, cp)] = o1.reshape(mt, cp)     # 128-aligned lanes
        # shortcut slot (projection weights or padded identity live in w2s rows [9*Cp:])
        xs = x_ref[:, sds(1, ho), sds(1, wo), :]
        im2_ref[:, pl.ds(9 * cp, cin)] = xs.reshape(mt, cin).astype(compute_dtype)

        acc2 = jnp.dot(im2_ref[...], w2s_ref[...], preferred_element_type=jnp.float32)
        o_ref[...] = jnp.maximum(acc2, 0.0).reshape(bb, ho, wo, cp).astype(o_ref.dtype)

    return kernel


class BasicBlockPallas:
    expansion = 1

    def __init__(self, in_planes, planes, stride=1, key=None,
                 compute_dtype=jnp.bfloat16):
        if key is None:
            key = jax.random.PRNGKey(0)
        k1, k2, k3 = jax.random.split(key, 3)

        def init(k, shape):  # deterministic kaiming-uniform-ish init, HWIO layout
            fan_in = shape[0] * shape[1] * shape[2]
            bound = (1.0 / fan_in) ** 0.5
            return jax.random.uniform(k, shape, jnp.float32, -bound, bound)

        self.in_planes = in_planes
        self.planes = planes
        self.stride = stride
        self.compute_dtype = compute_dtype
        out_planes = self.expansion * planes

        # f32 HWIO weights (reference semantics)
        self.w1 = init(k1, (3, 3, in_planes, planes))     # conv1: 3x3, stride s
        self.w2 = init(k2, (3, 3, planes, planes))        # conv2: 3x3, stride 1
        self.has_projection = (stride != 1) or (in_planes != out_planes)
        self.ws = (init(k3, (1, 1, in_planes, out_planes))
                   if self.has_projection else None)      # shortcut: 1x1, stride s

        # Pre-packed kernel operands: Cout padded to a multiple of 128 (lane-dense stores),
        # conv2 taps stacked along K, shortcut (projection OR padded identity) appended as
        # extra K rows so it rides the same matmul, all cast once to the MXU compute dtype.
        cp = _round_up(out_planes, 128)
        self.cp = cp
        w1p = jnp.zeros((3, 3, in_planes, cp), jnp.float32).at[..., :planes].set(self.w1)
        self.w1p = w1p.reshape(9, in_planes, cp).astype(compute_dtype)          # (9, Cin, Cp)

        w2p = jnp.zeros((3, 3, cp, cp), jnp.float32).at[:, :, :planes, :planes].set(self.w2)
        w2p = w2p.reshape(9 * cp, cp)
        if self.has_projection:
            wsp = jnp.zeros((in_planes, cp), jnp.float32).at[:, :out_planes].set(
                self.ws.reshape(in_planes, out_planes))
        else:
            wsp = jnp.eye(in_planes, cp, dtype=jnp.float32)   # identity pass-through rows
        self.w2s = jnp.concatenate([w2p, wsp], axis=0).astype(compute_dtype)    # (9*Cp+Cin, Cp)

    def __call__(self, x_nchw):
        n, cin, h, w = x_nchw.shape
        s = self.stride
        ho = (h + 2 - 3) // s + 1
        wo = (w + 2 - 3) // s + 1
        hp, wp = h + 2, w + 2
        cp = self.cp
        m1 = ho * wo
        k2 = 9 * cp + cin
        out_planes = self.expansion * self.planes

        bb = _pick_batch_block(n, hp, wp, cin, ho, wo, cp, m1, k2)
        mt = bb * m1

        # NCHW -> NHWC and 1-pixel zero pad (conv1's padding).  Only XLA-side data prep:
        # no im2col in HBM, no HBM round trip between the two convs.
        x = jnp.transpose(x_nchw, (0, 2, 3, 1)).astype(jnp.float32)
        xp = jnp.pad(x, ((0, 0), (1, 1), (1, 1), (0, 0)))

        kernel = _make_basic_block_kernel(bb, ho, wo, cin, cp, s, self.compute_dtype)

        est = _vmem_estimate(bb, hp, wp, cin, ho, wo, cp, m1, k2)
        vmem_limit = int(max(32 * 1024 * 1024, min(96 * 1024 * 1024, 2 * est)))

        w_itemsize = jnp.dtype(self.compute_dtype).itemsize
        flops = 2 * n * m1 * (9 * cin * cp + k2 * cp)
        bytes_accessed = (n * hp * wp * cin * 4
                          + (self.w1p.size + self.w2s.size) * w_itemsize
                          + n * m1 * cp * w_itemsize)

        out_padded = pl.pallas_call(
            kernel,
            out_shape=jax.ShapeDtypeStruct((n, ho, wo, cp), self.compute_dtype),
            grid=(n // bb,),
            in_specs=[
                pl.BlockSpec((bb, hp, wp, cin), lambda i: (i, 0, 0, 0)),  # batch block
                pl.BlockSpec((9, cin, cp), lambda i: (0, 0, 0)),          # resident weights
                pl.BlockSpec((k2, cp), lambda i: (0, 0)),
            ],
            out_specs=pl.BlockSpec((bb, ho, wo, cp), lambda i: (i, 0, 0, 0)),
            scratch_shapes=[
                pltpu.VMEM((bb, ho + 2, wo + 2, cp), self.compute_dtype),  # relu(conv1)+halo
                pltpu.VMEM((mt, k2), self.compute_dtype),                  # conv2 im2col
            ],
            compiler_params=pltpu.CompilerParams(
                dimension_semantics=("parallel",),
                vmem_limit_bytes=vmem_limit,
            ),
            cost_estimate=pl.CostEstimate(
                flops=flops, transcendentals=0, bytes_accessed=bytes_accessed),
        )(xp, self.w1p, self.w2s)

        # Slice off channel padding + cast back; fuses with the transpose back to NCHW.
        out = out_padded[..., :out_planes].astype(x_nchw.dtype)
        return jnp.transpose(out, (0, 3, 1, 2))


# --------------------------- pure-JAX reference (f32) ----------------------------- #

def _reference_forward(block, x_nchw):
    x = jnp.transpose(x_nchw, (0, 2, 3, 1)).astype(jnp.float32)
    dn = ('NHWC', 'HWIO', 'NHWC')
    s = block.stride
    out = lax.conv_general_dilated(x, block.w1, (s, s), ((1, 1), (1, 1)),
                                   dimension_numbers=dn)
    out = jnp.maximum(out, 0.0)
    out = lax.conv_general_dilated(out, block.w2, (1, 1), ((1, 1), (1, 1)),
                                   dimension_numbers=dn)
    if block.has_projection:
        sc = lax.conv_general_dilated(x, block.ws, (s, s), ((0, 0), (0, 0)),
                                      dimension_numbers=dn)
    else:
        sc = x
    out = jnp.maximum(out + sc, 0.0)
    return jnp.transpose(out, (0, 3, 1, 2))


if __name__ == "__main__":
    root = jax.random.PRNGKey(0)
    kx1, kx2, kb1, kb2 = jax.random.split(root, 4)

    # Case 1: projection shortcut (stride=2, in_planes != planes)
    x1 = jax.random.normal(kx1, (2, 4, 16, 16), dtype=jnp.float32)
    blk1 = BasicBlockPallas(in_planes=4, planes=8, stride=2, key=kb1)
    y1 = jax.block_until_ready(jax.jit(blk1.__call__)(x1))
    r1 = jax.block_until_ready(_reference_forward(blk1, x1))
    assert y1.shape == (2, 8, 8, 8), y1.shape

    # Case 2: identity shortcut (stride=1, in_planes == planes)
    x2 = jax.random.normal(kx2, (2, 8, 16, 16), dtype=jnp.float32)
    blk2 = BasicBlockPallas(in_planes=8, planes=8, stride=1, key=kb2)
    y2 = jax.block_until_ready(jax.jit(blk2.__call__)(x2))
    r2 = jax.block_until_ready(_reference_forward(blk2, x2))
    assert y2.shape == (2, 8, 16, 16), y2.shape

    # Kernel uses bf16 MXU operands / bf16 intermediate + output storage with f32
    # accumulation; reference is pure f32, so tolerance is bf16-level.
    ok1 = bool(jnp.allclose(y1, r1, atol=4e-2, rtol=4e-2))
    ok2 = bool(jnp.allclose(y2, r2, atol=4e-2, rtol=4e-2))
    if not (ok1 and ok2):
        raise RuntimeError("Pallas BasicBlock does not match JAX reference")
    print("KERNEL_OK")
</pallas_src>

<mosaic_0001>
module attributes {stable_mosaic.version = 11 : i64} {
  func.func @kernel(%arg0: i32, %arg1: memref<1x18x18x4xf32, #tpu.memory_space<vmem>>, %arg2: memref<9x4x128xbf16, #tpu.memory_space<vmem>>, %arg3: memref<1156x128xbf16, #tpu.memory_space<vmem>>, %arg4: memref<1x8x8x128xbf16, #tpu.memory_space<vmem>>, %arg5: memref<1x10x10x128xbf16, #tpu.memory_space<vmem>>, %arg6: memref<64x1156xbf16, #tpu.memory_space<vmem>>) attributes {dimension_semantics = [#tpu.dimension_semantics<parallel>], iteration_bounds = array<i64: 2>, scalar_prefetch = 0 : i64, scratch_operands = 2 : i64, tpu.core_type = #tpu.core_type<tc>, window_params = [{transform_indices = @transform_0, window_bounds = array<i64: 1, 18, 18, 4>}, {pipeline_mode = #tpu.pipeline_mode<synchronous>, transform_indices = @transform_1, window_bounds = array<i64: 9, 4, 128>}, {pipeline_mode = #tpu.pipeline_mode<synchronous>, transform_indices = @transform_2, window_bounds = array<i64: 1156, 128>}, {transform_indices = @transform_3, window_bounds = array<i64: 1, 8, 8, 128>}]} {
    %cst = arith.constant 0.000000e+00 : bf16
    %0 = vector.broadcast %cst : bf16 to vector<1x1x10x128xbf16>
    %cst_0 = arith.constant 0.000000e+00 : bf16
    %1 = vector.broadcast %cst_0 : bf16 to vector<1x10x1x128xbf16>
    %c0 = arith.constant 0 : index
    %c0_1 = arith.constant 0 : index
    %c0_2 = arith.constant 0 : index
    %c0_3 = arith.constant 0 : index
    %2 = vector.load %arg5[%c0, %c0_1, %c0_2, %c0_3] : memref<1x10x10x128xbf16, #tpu.memory_space<vmem>>, vector<1x1x10x128xbf16>
    tpu.vector_store %arg5[%c0, %c0_1, %c0_2, %c0_3], %0 {strides = array<i32>} : memref<1x10x10x128xbf16, #tpu.memory_space<vmem>>, vector<1x1x10x128xbf16>,
    %c0_4 = arith.constant 0 : index
    %c9 = arith.constant 9 : index
    %c0_5 = arith.constant 0 : index
    %c0_6 = arith.constant 0 : index
    %3 = vector.load %arg5[%c0_4, %c9, %c0_5, %c0_6] : memref<1x10x10x128xbf16, #tpu.memory_space<vmem>>, vector<1x1x10x128xbf16>
    tpu.vector_store %arg5[%c0_4, %c9, %c0_5, %c0_6], %0 {strides = array<i32>} : memref<1x10x10x128xbf16, #tpu.memory_space<vmem>>, vector<1x1x10x128xbf16>,
    %c0_7 = arith.constant 0 : index
    %c0_8 = arith.constant 0 : index
    %c0_9 = arith.constant 0 : index
    %c0_10 = arith.constant 0 : index
    %4 = vector.load %arg5[%c0_7, %c0_8, %c0_9, %c0_10] : memref<1x10x10x128xbf16, #tpu.memory_space<vmem>>, vector<1x10x1x128xbf16>
    tpu.vector_store %arg5[%c0_7, %c0_8, %c0_9, %c0_10], %1 {strides = array<i32>} : memref<1x10x10x128xbf16, #tpu.memory_space<vmem>>, vector<1x10x1x128xbf16>,
    %c0_11 = arith.constant 0 : index
    %c0_12 = arith.constant 0 : index
    %c9_13 = arith.constant 9 : index
    %c0_14 = arith.constant 0 : index
    %5 = vector.load %arg5[%c0_11, %c0_12, %c9_13, %c0_14] : memref<1x10x10x128xbf16, #tpu.memory_space<vmem>>, vector<1x10x1x128xbf16>
    tpu.vector_store %arg5[%c0_11, %c0_12, %c9_13, %c0_14], %1 {strides = array<i32>} : memref<1x10x10x128xbf16, #tpu.memory_space<vmem>>, vector<1x10x1x128xbf16>,
    %cst_15 = arith.constant 0.000000e+00 : f32
    %6 = vector.broadcast %cst_15 : f32 to vector<64x128xf32>
    %c0_16 = arith.constant 0 : index
    %c0_17 = arith.constant 0 : index
    %c0_18 = arith.constant 0 : index
    %c0_19 = arith.constant 0 : index
    %7 = tpu.strided_load %arg1[%c0_16, %c0_17, %c0_18, %c0_19] {strides = array<i32: 1, 2, 2, 1>} : memref<1x18x18x4xf32, #tpu.memory_space<vmem>>, vector<1x8x8x4xf32>
    %8 = vector.shape_cast %7 : vector<1x8x8x4xf32> to vector<64x4xf32>
    %9 = arith.truncf %8 : vector<64x4xf32> to vector<64x4xbf16>
    %c0_20 = arith.constant 0 : index
    %c0_21 = arith.constant 0 : index
    %c0_22 = arith.constant 0 : index
    %10 = vector.load %arg2[%c0_20, %c0_21, %c0_22] : memref<9x4x128xbf16, #tpu.memory_space<vmem>>, vector<1x4x128xbf16>
    %11 = vector.shape_cast %10 : vector<1x4x128xbf16> to vector<4x128xbf16>
    %cst_23 = arith.constant dense<0.000000e+00> : vector<64x128xf32>
    %12 = tpu.matmul %9, %11, %cst_23 {dimension_numbers = #tpu.dot_dimension_numbers<[1], [0], [0], [1], [0, 0, 1, 1], [], []>} : vector<64x4xbf16>, vector<4x128xbf16>, vector<64x128xf32> -> vector<64x128xf32>
    %13 = arith.addf %6, %12 : vector<64x128xf32>
    %c0_24 = arith.constant 0 : index
    %c0_25 = arith.constant 0 : index
    %c1 = arith.constant 1 : index
    %c0_26 = arith.constant 0 : index
    %14 = tpu.strided_load %arg1[%c0_24, %c0_25, %c1, %c0_26] {strides = array<i32: 1, 2, 2, 1>} : memref<1x18x18x4xf32, #tpu.memory_space<vmem>>, vector<1x8x8x4xf32>
    %15 = vector.shape_cast %14 : vector<1x8x8x4xf32> to vector<64x4xf32>
    %16 = arith.truncf %15 : vector<64x4xf32> to vector<64x4xbf16>
    %c1_27 = arith.constant 1 : index
    %c0_28 = arith.constant 0 : index
    %c0_29 = arith.constant 0 : index
    %17 = vector.load %arg2[%c1_27, %c0_28, %c0_29] : memref<9x4x128xbf16, #tpu.memory_space<vmem>>, vector<1x4x128xbf16>
    %18 = vector.shape_cast %17 : vector<1x4x128xbf16> to vector<4x128xbf16>
    %cst_30 = arith.constant dense<0.000000e+00> : vector<64x128xf32>
    %19 = tpu.matmul %16, %18, %cst_30 {dimension_numbers = #tpu.dot_dimension_numbers<[1], [0], [0], [1], [0, 0, 1, 1], [], []>} : vector<64x4xbf16>, vector<4x128xbf16>, vector<64x128xf32> -> vector<64x128xf32>
    %20 = arith.addf %13, %19 : vector<64x128xf32>
    %c0_31 = arith.constant 0 : index
    %c0_32 = arith.constant 0 : index
    %c2 = arith.constant 2 : index
    %c0_33 = arith.constant 0 : index
    %21 = tpu.strided_load %arg1[%c0_31, %c0_32, %c2, %c0_33] {strides = array<i32: 1, 2, 2, 1>} : memref<1x18x18x4xf32, #tpu.memory_space<vmem>>, vector<1x8x8x4xf32>
    %22 = vector.shape_cast %21 : vector<1x8x8x4xf32> to vector<64x4xf32>
    %23 = arith.truncf %22 : vector<64x4xf32> to vector<64x4xbf16>
    %c2_34 = arith.constant 2 : index
    %c0_35 = arith.constant 0 : index
    %c0_36 = arith.constant 0 : index
    %24 = vector.load %arg2[%c2_34, %c0_35, %c0_36] : memref<9x4x128xbf16, #tpu.memory_space<vmem>>, vector<1x4x128xbf16>
    %25 = vector.shape_cast %24 : vector<1x4x128xbf16> to vector<4x128xbf16>
    %cst_37 = arith.constant dense<0.000000e+00> : vector<64x128xf32>
    %26 = tpu.matmul %23, %25, %cst_37 {dimension_numbers = #tpu.dot_dimension_numbers<[1], [0], [0], [1], [0, 0, 1, 1], [], []>} : vector<64x4xbf16>, vector<4x128xbf16>, vector<64x128xf32> -> vector<64x128xf32>
    %27 = arith.addf %20, %26 : vector<64x128xf32>
    %c0_38 = arith.constant 0 : index
    %c1_39 = arith.constant 1 : index
    %c0_40 = arith.constant 0 : index
    %c0_41 = arith.constant 0 : index
    %28 = tpu.strided_load %arg1[%c0_38, %c1_39, %c0_40, %c0_41] {strides = array<i32: 1, 2, 2, 1>} : memref<1x18x18x4xf32, #tpu.memory_space<vmem>>, vector<1x8x8x4xf32>
    %29 = vector.shape_cast %28 : vector<1x8x8x4xf32> to vector<64x4xf32>
    %30 = arith.truncf %29 : vector<64x4xf32> to vector<64x4xbf16>
    %c3 = arith.constant 3 : index
    %c0_42 = arith.constant 0 : index
    %c0_43 = arith.constant 0 : index
    %31 = vector.load %arg2[%c3, %c0_42, %c0_43] : memref<9x4x128xbf16, #tpu.memory_space<vmem>>, vector<1x4x128xbf16>
    %32 = vector.shape_cast %31 : vector<1x4x128xbf16> to vector<4x128xbf16>
    %cst_44 = arith.constant dense<0.000000e+00> : vector<64x128xf32>
    %33 = tpu.matmul %30, %32, %cst_44 {dimension_numbers = #tpu.dot_dimension_numbers<[1], [0], [0], [1], [0, 0, 1, 1], [], []>} : vector<64x4xbf16>, vector<4x128xbf16>, vector<64x128xf32> -> vector<64x128xf32>
    %34 = arith.addf %27, %33 : vector<64x128xf32>
    %c0_45 = arith.constant 0 : index
    %c1_46 = arith.constant 1 : index
    %c1_47 = arith.constant 1 : index
    %c0_48 = arith.constant 0 : index
    %35 = tpu.strided_load %arg1[%c0_45, %c1_46, %c1_47, %c0_48] {strides = array<i32: 1, 2, 2, 1>} : memref<1x18x18x4xf32, #tpu.memory_space<vmem>>, vector<1x8x8x4xf32>
    %36 = vector.shape_cast %35 : vector<1x8x8x4xf32> to vector<64x4xf32>
    %37 = arith.truncf %36 : vector<64x4xf32> to vector<64x4xbf16>
    %c4 = arith.constant 4 : index
    %c0_49 = arith.constant 0 : index
    %c0_50 = arith.constant 0 : index
    %38 = vector.load %arg2[%c4, %c0_49, %c0_50] : memref<9x4x128xbf16, #tpu.memory_space<vmem>>, vector<1x4x128xbf16>
    %39 = vector.shape_cast %38 : vector<1x4x128xbf16> to vector<4x128xbf16>
    %cst_51 = arith.constant dense<0.000000e+00> : vector<64x128xf32>
    %40 = tpu.matmul %37, %39, %cst_51 {dimension_numbers = #tpu.dot_dimension_numbers<[1], [0], [0], [1], [0, 0, 1, 1], [], []>} : vector<64x4xbf16>, vector<4x128xbf16>, vector<64x128xf32> -> vector<64x128xf32>
    %41 = arith.addf %34, %40 : vector<64x128xf32>
    %c0_52 = arith.constant 0 : index
    %c1_53 = arith.constant 1 : index
    %c2_54 = arith.constant 2 : index
    %c0_55 = arith.constant 0 : index
    %42 = tpu.strided_load %arg1[%c0_52, %c1_53, %c2_54, %c0_55] {strides = array<i32: 1, 2, 2, 1>} : memref<1x18x18x4xf32, #tpu.memory_space<vmem>>, vector<1x8x8x4xf32>
    %43 = vector.shape_cast %42 : vector<1x8x8x4xf32> to vector<64x4xf32>
    %44 = arith.truncf %43 : vector<64x4xf32> to vector<64x4xbf16>
    %c5 = arith.constant 5 : index
    %c0_56 = arith.constant 0 : index
    %c0_57 = arith.constant 0 : index
    %45 = vector.load %arg2[%c5, %c0_56, %c0_57] : memref<9x4x128xbf16, #tpu.memory_space<vmem>>, vector<1x4x128xbf16>
    %46 = vector.shape_cast %45 : vector<1x4x128xbf16> to vector<4x128xbf16>
    %cst_58 = arith.constant dense<0.000000e+00> : vector<64x128xf32>
    %47 = tpu.matmul %44, %46, %cst_58 {dimension_numbers = #tpu.dot_dimension_numbers<[1], [0], [0], [1], [0, 0, 1, 1], [], []>} : vector<64x4xbf16>, vector<4x128xbf16>, vector<64x128xf32> -> vector<64x128xf32>
    %48 = arith.addf %41, %47 : vector<64x128xf32>
    %c0_59 = arith.constant 0 : index
    %c2_60 = arith.constant 2 : index
    %c0_61 = arith.constant 0 : index
    %c0_62 = arith.constant 0 : index
    %49 = tpu.strided_load %arg1[%c0_59, %c2_60, %c0_61, %c0_62] {strides = array<i32: 1, 2, 2, 1>} : memref<1x18x18x4xf32, #tpu.memory_space<vmem>>, vector<1x8x8x4xf32>
    %50 = vector.shape_cast %49 : vector<1x8x8x4xf32> to vector<64x4xf32>
    %51 = arith.truncf %50 : vector<64x4xf32> to vector<64x4xbf16>
    %c6 = arith.constant 6 : index
    %c0_63 = arith.constant 0 : index
    %c0_64 = arith.constant 0 : index
    %52 = vector.load %arg2[%c6, %c0_63, %c0_64] : memref<9x4x128xbf16, #tpu.memory_space<vmem>>, vector<1x4x128xbf16>
    %53 = vector.shape_cast %52 : vector<1x4x128xbf16> to vector<4x128xbf16>
    %cst_65 = arith.constant dense<0.000000e+00> : vector<64x128xf32>
    %54 = tpu.matmul %51, %53, %cst_65 {dimension_numbers = #tpu.dot_dimension_numbers<[1], [0], [0], [1], [0, 0, 1, 1], [], []>} : vector<64x4xbf16>, vector<4x128xbf16>, vector<64x128xf32> -> vector<64x128xf32>
    %55 = arith.addf %48, %54 : vector<64x128xf32>
    %c0_66 = arith.constant 0 : index
    %c2_67 = arith.constant 2 : index
    %c1_68 = arith.constant 1 : index
    %c0_69 = arith.constant 0 : index
    %56 = tpu.strided_load %arg1[%c0_66, %c2_67, %c1_68, %c0_69] {strides = array<i32: 1, 2, 2, 1>} : memref<1x18x18x4xf32, #tpu.memory_space<vmem>>, vector<1x8x8x4xf32>
    %57 = vector.shape_cast %56 : vector<1x8x8x4xf32> to vector<64x4xf32>
    %58 = arith.truncf %57 : vector<64x4xf32> to vector<64x4xbf16>
    %c7 = arith.constant 7 : index
    %c0_70 = arith.constant 0 : index
    %c0_71 = arith.constant 0 : index
    %59 = vector.load %arg2[%c7, %c0_70, %c0_71] : memref<9x4x128xbf16, #tpu.memory_space<vmem>>, vector<1x4x128xbf16>
    %60 = vector.shape_cast %59 : vector<1x4x128xbf16> to vector<4x128xbf16>
    %cst_72 = arith.constant dense<0.000000e+00> : vector<64x128xf32>
    %61 = tpu.matmul %58, %60, %cst_72 {dimension_numbers = #tpu.dot_dimension_numbers<[1], [0], [0], [1], [0, 0, 1, 1], [], []>} : vector<64x4xbf16>, vector<4x128xbf16>, vector<64x128xf32> -> vector<64x128xf32>
    %62 = arith.addf %55, %61 : vector<64x128xf32>
    %c0_73 = arith.constant 0 : index
    %c2_74 = arith.constant 2 : index
    %c2_75 = arith.constant 2 : index
    %c0_76 = arith.constant 0 : index
    %63 = tpu.strided_load %arg1[%c0_73, %c2_74, %c2_75, %c0_76] {strides = array<i32: 1, 2, 2, 1>} : memref<1x18x18x4xf32, #tpu.memory_space<vmem>>, vector<1x8x8x4xf32>
    %64 = vector.shape_cast %63 : vector<1x8x8x4xf32> to vector<64x4xf32>
    %65 = arith.truncf %64 : vector<64x4xf32> to vector<64x4xbf16>
    %c8 = arith.constant 8 : index
    %c0_77 = arith.constant 0 : index
    %c0_78 = arith.constant 0 : index
    %66 = vector.load %arg2[%c8, %c0_77, %c0_78] : memref<9x4x128xbf16, #tpu.memory_space<vmem>>, vector<1x4x128xbf16>
    %67 = vector.shape_cast %66 : vector<1x4x128xbf16> to vector<4x128xbf16>
    %cst_79 = arith.constant dense<0.000000e+00> : vector<64x128xf32>
    %68 = tpu.matmul %65, %67, %cst_79 {dimension_numbers = #tpu.dot_dimension_numbers<[1], [0], [0], [1], [0, 0, 1, 1], [], []>} : vector<64x4xbf16>, vector<4x128xbf16>, vector<64x128xf32> -> vector<64x128xf32>
    %69 = arith.addf %62, %68 : vector<64x128xf32>
    %cst_80 = arith.constant 0.000000e+00 : f32
    %70 = vector.broadcast %cst_80 : f32 to vector<64x128xf32>
    %71 = arith.maximumf %69, %70 : vector<64x128xf32>
    %72 = arith.truncf %71 : vector<64x128xf32> to vector<64x128xbf16>
    %73 = vector.shape_cast %72 : vector<64x128xbf16> to vector<1x8x8x128xbf16>
    %c0_81 = arith.constant 0 : index
    %c1_82 = arith.constant 1 : index
    %c1_83 = arith.constant 1 : index
    %c0_84 = arith.constant 0 : index
    %74 = vector.load %arg5[%c0_81, %c1_82, %c1_83, %c0_84] : memref<1x10x10x128xbf16, #tpu.memory_space<vmem>>, vector<1x8x8x128xbf16>
    tpu.vector_store %arg5[%c0_81, %c1_82, %c1_83, %c0_84], %73 {strides = array<i32>} : memref<1x10x10x128xbf16, #tpu.memory_space<vmem>>, vector<1x8x8x128xbf16>,
    %c0_85 = arith.constant 0 : index
    %c0_86 = arith.constant 0 : index
    %c0_87 = arith.constant 0 : index
    %c0_88 = arith.constant 0 : index
    %75 = vector.load %arg5[%c0_85, %c0_86, %c0_87, %c0_88] : memref<1x10x10x128xbf16, #tpu.memory_space<vmem>>, vector<1x8x8x128xbf16>
    %76 = vector.shape_cast %75 : vector<1x8x8x128xbf16> to vector<64x128xbf16>
    %c0_89 = arith.constant 0 : index
    %c0_90 = arith.constant 0 : index
    %77 = vector.load %arg6[%c0_89, %c0_90] : memref<64x1156xbf16, #tpu.memory_space<vmem>>, vector<64x128xbf16>
    tpu.vector_store %arg6[%c0_89, %c0_90], %76 {strides = array<i32>} : memref<64x1156xbf16, #tpu.memory_space<vmem>>, vector<64x128xbf16>,
    %c0_91 = arith.constant 0 : index
    %c0_92 = arith.constant 0 : index
    %c1_93 = arith.constant 1 : index
    %c0_94 = arith.constant 0 : index
    %78 = vector.load %arg5[%c0_91, %c0_92, %c1_93, %c0_94] : memref<1x10x10x128xbf16, #tpu.memory_space<vmem>>, vector<1x8x8x128xbf16>
    %79 = vector.shape_cast %78 : vector<1x8x8x128xbf16> to vector<64x128xbf16>
    %c0_95 = arith.constant 0 : index
    %c128 = arith.constant 128 : index
    %80 = vector.load %arg6[%c0_95, %c128] : memref<64x1156xbf16, #tpu.memory_space<vmem>>, vector<64x128xbf16>
    tpu.vector_store %arg6[%c0_95, %c128], %79 {strides = array<i32>} : memref<64x1156xbf16, #tpu.memory_space<vmem>>, vector<64x128xbf16>,
    %c0_96 = arith.constant 0 : index
    %c0_97 = arith.constant 0 : index
    %c2_98 = arith.constant 2 : index
    %c0_99 = arith.constant 0 : index
    %81 = vector.load %arg5[%c0_96, %c0_97, %c2_98, %c0_99] : memref<1x10x10x128xbf16, #tpu.memory_space<vmem>>, vector<1x8x8x128xbf16>
    %82 = vector.shape_cast %81 : vector<1x8x8x128xbf16> to vector<64x128xbf16>
    %c0_100 = arith.constant 0 : index
    %c256 = arith.constant 256 : index
    %83 = vector.load %arg6[%c0_100, %c256] : memref<64x1156xbf16, #tpu.memory_space<vmem>>, vector<64x128xbf16>
    tpu.vector_store %arg6[%c0_100, %c256], %82 {strides = array<i32>} : memref<64x1156xbf16, #tpu.memory_space<vmem>>, vector<64x128xbf16>,
    %c0_101 = arith.constant 0 : index
    %c1_102 = arith.constant 1 : index
    %c0_103 = arith.constant 0 : index
    %c0_104 = arith.constant 0 : index
    %84 = vector.load %arg5[%c0_101, %c1_102, %c0_103, %c0_104] : memref<1x10x10x128xbf16, #tpu.memory_space<vmem>>, vector<1x8x8x128xbf16>
    %85 = vector.shape_cast %84 : vector<1x8x8x128xbf16> to vector<64x128xbf16>
    %c0_105 = arith.constant 0 : index
    %c384 = arith.constant 384 : index
    %86 = vector.load %arg6[%c0_105, %c384] : memref<64x1156xbf16, #tpu.memory_space<vmem>>, vector<64x128xbf16>
    tpu.vector_store %arg6[%c0_105, %c384], %85 {strides = array<i32>} : memref<64x1156xbf16, #tpu.memory_space<vmem>>, vector<64x128xbf16>,
    %c0_106 = arith.constant 0 : index
    %c1_107 = arith.constant 1 : index
    %c1_108 = arith.constant 1 : index
    %c0_109 = arith.constant 0 : index
    %87 = vector.load %arg5[%c0_106, %c1_107, %c1_108, %c0_109] : memref<1x10x10x128xbf16, #tpu.memory_space<vmem>>, vector<1x8x8x128xbf16>
    %88 = vector.shape_cast %87 : vector<1x8x8x128xbf16> to vector<64x128xbf16>
    %c0_110 = arith.constant 0 : index
    %c512 = arith.constant 512 : index
    %89 = vector.load %arg6[%c0_110, %c512] : memref<64x1156xbf16, #tpu.memory_space<vmem>>, vector<64x128xbf16>
    tpu.vector_store %arg6[%c0_110, %c512], %88 {strides = array<i32>} : memref<64x1156xbf16, #tpu.memory_space<vmem>>, vector<64x128xbf16>,
    %c0_111 = arith.constant 0 : index
    %c1_112 = arith.constant 1 : index
    %c2_113 = arith.constant 2 : index
    %c0_114 = arith.constant 0 : index
    %90 = vector.load %arg5[%c0_111, %c1_112, %c2_113, %c0_114] : memref<1x10x10x128xbf16, #tpu.memory_space<vmem>>, vector<1x8x8x128xbf16>
    %91 = vector.shape_cast %90 : vector<1x8x8x128xbf16> to vector<64x128xbf16>
    %c0_115 = arith.constant 0 : index
    %c640 = arith.constant 640 : index
    %92 = vector.load %arg6[%c0_115, %c640] : memref<64x1156xbf16, #tpu.memory_space<vmem>>, vector<64x128xbf16>
    tpu.vector_store %arg6[%c0_115, %c640], %91 {strides = array<i32>} : memref<64x1156xbf16, #tpu.memory_space<vmem>>, vector<64x128xbf16>,
    %c0_116 = arith.constant 0 : index
    %c2_117 = arith.constant 2 : index
    %c0_118 = arith.constant 0 : index
    %c0_119 = arith.constant 0 : index
    %93 = vector.load %arg5[%c0_116, %c2_117, %c0_118, %c0_119] : memref<1x10x10x128xbf16, #tpu.memory_space<vmem>>, vector<1x8x8x128xbf16>
    %94 = vector.shape_cast %93 : vector<1x8x8x128xbf16> to vector<64x128xbf16>
    %c0_120 = arith.constant 0 : index
    %c768 = arith.constant 768 : index
    %95 = vector.load %arg6[%c0_120, %c768] : memref<64x1156xbf16, #tpu.memory_space<vmem>>, vector<64x128xbf16>
    tpu.vector_store %arg6[%c0_120, %c768], %94 {strides = array<i32>} : memref<64x1156xbf16, #tpu.memory_space<vmem>>, vector<64x128xbf16>,
    %c0_121 = arith.constant 0 : index
    %c2_122 = arith.constant 2 : index
    %c1_123 = arith.constant 1 : index
    %c0_124 = arith.constant 0 : index
    %96 = vector.load %arg5[%c0_121, %c2_122, %c1_123, %c0_124] : memref<1x10x10x128xbf16, #tpu.memory_space<vmem>>, vector<1x8x8x128xbf16>
    %97 = vector.shape_cast %96 : vector<1x8x8x128xbf16> to vector<64x128xbf16>
    %c0_125 = arith.constant 0 : index
    %c896 = arith.constant 896 : index
    %98 = vector.load %arg6[%c0_125, %c896] : memref<64x1156xbf16, #tpu.memory_space<vmem>>, vector<64x128xbf16>
    tpu.vector_store %arg6[%c0_125, %c896], %97 {strides = array<i32>} : memref<64x1156xbf16, #tpu.memory_space<vmem>>, vector<64x128xbf16>,
    %c0_126 = arith.constant 0 : index
    %c2_127 = arith.constant 2 : index
    %c2_128 = arith.constant 2 : index
    %c0_129 = arith.constant 0 : index
    %99 = vector.load %arg5[%c0_126, %c2_127, %c2_128, %c0_129] : memref<1x10x10x128xbf16, #tpu.memory_space<vmem>>, vector<1x8x8x128xbf16>
    %100 = vector.shape_cast %99 : vector<1x8x8x128xbf16> to vector<64x128xbf16>
    %c0_130 = arith.constant 0 : index
    %c1024 = arith.constant 1024 : index
    %101 = vector.load %arg6[%c0_130, %c1024] : memref<64x1156xbf16, #tpu.memory_space<vmem>>, vector<64x128xbf16>
    tpu.vector_store %arg6[%c0_130, %c1024], %100 {strides = array<i32>} : memref<64x1156xbf16, #tpu.memory_space<vmem>>, vector<64x128xbf16>,
    %c0_131 = arith.constant 0 : index
    %c1_132 = arith.constant 1 : index
    %c1_133 = arith.constant 1 : index
    %c0_134 = arith.constant 0 : index
    %102 = tpu.strided_load %arg1[%c0_131, %c1_132, %c1_133, %c0_134] {strides = array<i32: 1, 2, 2, 1>} : memref<1x18x18x4xf32, #tpu.memory_space<vmem>>, vector<1x8x8x4xf32>
    %103 = vector.shape_cast %102 : vector<1x8x8x4xf32> to vector<64x4xf32>
    %104 = arith.truncf %103 : vector<64x4xf32> to vector<64x4xbf16>
    %c0_135 = arith.constant 0 : index
    %c1152 = arith.constant 1152 : index
    %105 = vector.load %arg6[%c0_135, %c1152] : memref<64x1156xbf16, #tpu.memory_space<vmem>>, vector<64x4xbf16>
    tpu.vector_store %arg6[%c0_135, %c1152], %104 {strides = array<i32>} : memref<64x1156xbf16, #tpu.memory_space<vmem>>, vector<64x4xbf16>,
    %c0_136 = arith.constant 0 : index
    %c0_137 = arith.constant 0 : index
    %106 = vector.load %arg6[%c0_136, %c0_137] : memref<64x1156xbf16, #tpu.memory_space<vmem>>, vector<64x1156xbf16>
    %c0_138 = arith.constant 0 : index
    %c0_139 = arith.constant 0 : index
    %107 = vector.load %arg3[%c0_138, %c0_139] : memref<1156x128xbf16, #tpu.memory_space<vmem>>, vector<1156x128xbf16>
    %cst_140 = arith.constant dense<0.000000e+00> : vector<64x128xf32>
    %108 = tpu.matmul %106, %107, %cst_140 {dimension_numbers = #tpu.dot_dimension_numbers<[1], [0], [0], [1], [0, 0, 1, 1], [], []>} : vector<64x1156xbf16>, vector<1156x128xbf16>, vector<64x128xf32> -> vector<64x128xf32>
    %cst_141 = arith.constant 0.000000e+00 : f32
    %109 = vector.broadcast %cst_141 : f32 to vector<64x128xf32>
    %110 = arith.maximumf %108, %109 : vector<64x128xf32>
    %111 = vector.shape_cast %110 : vector<64x128xf32> to vector<1x8x8x128xf32>
    %112 = arith.truncf %111 : vector<1x8x8x128xf32> to vector<1x8x8x128xbf16>
    %c0_142 = arith.constant 0 : index
    %c0_143 = arith.constant 0 : index
    %c0_144 = arith.constant 0 : index
    %c0_145 = arith.constant 0 : index
    %113 = vector.load %arg4[%c0_142, %c0_143, %c0_144, %c0_145] : memref<1x8x8x128xbf16, #tpu.memory_space<vmem>>, vector<1x8x8x128xbf16>
    tpu.vector_store %arg4[%c0_142, %c0_143, %c0_144, %c0_145], %112 {strides = array<i32>} : memref<1x8x8x128xbf16, #tpu.memory_space<vmem>>, vector<1x8x8x128xbf16>,
    return
  }
  func.func @transform_0(%arg0: i32) -> (i32, i32, i32, i32) {
    %c0_i32 = arith.constant 0 : i32
    %c0_i32_0 = arith.constant 0 : i32
    %c0_i32_1 = arith.constant 0 : i32
    %c0_i32_2 = arith.constant 0 : i32
    return %arg0, %c0_i32, %c0_i32_0, %c0_i32_1 : i32, i32, i32, i32
  }
  func.func @transform_1(%arg0: i32) -> (i32, i32, i32) {
    %c0_i32 = arith.constant 0 : i32
    %c0_i32_0 = arith.constant 0 : i32
    %c0_i32_1 = arith.constant 0 : i32
    %c0_i32_2 = arith.constant 0 : i32
    return %c0_i32, %c0_i32_0, %c0_i32_1 : i32, i32, i32
  }
  func.func @transform_2(%arg0: i32) -> (i32, i32) {
    %c0_i32 = arith.constant 0 : i32
    %c0_i32_0 = arith.constant 0 : i32
    %c0_i32_1 = arith.constant 0 : i32
    return %c0_i32, %c0_i32_0 : i32, i32
  }
  func.func @transform_3(%arg0: i32) -> (i32, i32, i32, i32) {
    %c0_i32 = arith.constant 0 : i32
    %c0_i32_0 = arith.constant 0 : i32
    %c0_i32_1 = arith.constant 0 : i32
    %c0_i32_2 = arith.constant 0 : i32
    return %arg0, %c0_i32, %c0_i32_0, %c0_i32_1 : i32, i32, i32, i32
  }
}

</mosaic_0001>

<bundles_post_ra>
// kernel: a_call__.1
= control target key start
LH: loop header
LB: loop body
LE: loop exit
PB: predicated region body
PF: predicated region fallthrough
CT: control target
= control target key end

     0   :  { %s4119_s12 = smov 0   ;;  %s5011_s0 = inlined_call_operand.vmem [shape: f32[2,18,18,4], index: 0, kind: input, shape index: {}]   ;;  %s5012_s1 = inlined_call_operand.vmem [shape: bf16[9,4,128], index: 1, kind: input, shape index: {}]   ;;  %s5013_s2 = inlined_call_operand.vmem [shape: bf16[1156,128], index: 2, kind: input, shape index: {}]   ;;  %s5014_s3 = inlined_call_operand.vmem [shape: bf16[2,8,8,128], index: 3, kind: output, shape index: {}]  }
   0x1 LB: > { %s3291_s13 = sadd.s32 4294967295, %s4096_s12   ;;  %p3295_p0 = scmp.ge.s32.totalorder %s4096_s12, 1  ;;  %s4096_s12 = sphi %s4119_s12, %s13_s12  }
   0x2   : > { %p137_p1 = scmp.lt.s32.totalorder %s4096_s12, 3 }
   0x4   : > { %p138_p2 = pnand %p3295_p0, %p137_p1 }
   0x5   : > { %v3314_v0 = vld [vmem:[%s5012_s1 + $0x2] sm:$0x3] (!%p138_p2)  ;;  %vm297_vm0 = vcmask (!%p138_p2), 1041408   ;;  %p161_p3 = scmp.lt.s32.totalorder (!%p138_p2), %s3291_s13, 1  ;;  %v261_v2 = vld [vmem:[%s5012_s1] sm:$0x3] (!%p138_p2) }
   0x6   : > { %141 = sbr.rel (%p138_p2) target bundleno = 768 (0x300), region = 32  ;;  %3978 = vmatprep.subr.msk.bf16.mxu0 (!%p138_p2), %vm297_vm0, %v3314_v0  ;;  %v299_v1 = vsel (!%p138_p2), %vm297_vm0, %v3314_v0, 0  ;;  %vm284_vm1 = vcmask (!%p138_p2), 31744   ;;  %v379_v11 = vsel (!%p138_p2), %vm297_vm0, %v261_v2, 0  ;;  %v3331_v13 = vld [vmem:[%s5012_s1 + $0x4] sm:$0x3] (!%p138_p2) }
   0x7   : > { %3807 = vmatpush3.bf16.msra.mxu0 (!%p138_p2), %v299_v1  ;;  %v481_v26 = vsel (!%p138_p2), %vm297_vm0, %v3331_v13, 0  ;;  %v3344_v27 = vld [vmem:[%s5012_s1 + $0x6] sm:$0x3] (!%p138_p2)  ;;  %v3357_v32 = vld [vmem:[%s5012_s1 + $0x8] sm:$0x3] (!%p138_p2)  ;;  %vm177_vm2 = vcmask (!%p138_p2), 1040384  }
   0x8   : > { %3979 = vmatprep.subr.msk.bf16.mxu0 (!%p138_p2), %vm297_vm0, %v261_v2  ;;  %v3370_v33 = vld [vmem:[%s5012_s1 + $0xa] sm:$0x3] (!%p138_p2)  ;;  %v189_v35 = vld [vmem:[#allocation2 + $0x18] sm:$0x1] (!%p138_p2)  ;;  %v221_v36 = vld [vmem:[#allocation2 + $0x1c] sm:$0x1] (!%p138_p2) }
   0x9   : > { %v4098_v38 = vmov (!%p138_p2), 0   ;;  %vm178_vm3 = vsmask.f32 (!%p138_p2), 256  ;;  %vm210_vm4 = vsmask.f32 (!%p138_p2), 7938  ;;  %v591_v39 = vsel (!%p138_p2), %vm297_vm0, %v3344_v27, 0 }
   0xa   : > { %173 = vst [vmem:[#allocation2 + $0x4] sm:$0x1] (!%p138_p2), %v4098_v38  ;;  %176 = vst [vmem:[#allocation2 + $0x4c] sm:$0x1] (!%p138_p2), %v4098_v38  ;;  %v701_v43 = vsel (!%p138_p2), %vm297_vm0, %v3357_v32, 0  ;;  %v811_v48 = vsel (!%p138_p2), %vm297_vm0, %v3370_v33, 0 }
   0xb   : > { %172 = vst [vmem:[#allocation2] sm:$0xf] (!%p138_p2), %v4098_v38  ;;  %175 = vst [vmem:[#allocation2 + $0x48] sm:$0xf] (!%p138_p2), %v4098_v38  ;;  %v4013_v45 = vld [vmem:[%s5013_s2 + $0x230] sm:$0xff] (!%p138_p2)   ;;  %vm1329_vm7 = vcmask (!%p138_p2), 1043456  }
   0xc   : > { %vm4191_vm5 = vmand (!%p138_p2), %vm177_vm2, %vm178_vm3  ;;  %vm1598_vm9 = vcmask (!%p138_p2), 1042432   ;;  %vm1599_vm10 = vcmask (!%p138_p2), 1046532   ;;  %vm1431_vm11 = vsmask.f32 (!%p138_p2), 3328  ;;  %vm1432_vm12 = vsmask.f32 (!%p138_p2), 7440 }
   0xd   : > { %s5026_s13 = smov (!%p161_p3, %s3291_s13), 1  ;;  %v190_v44 = vsel %vm4191_vm5, 0, %v189_v35  ;;  %vm4202_vm6 = vmand %vm177_vm2, %vm210_vm4 }
   0xe   : > { %s3987_s18 = smul.u32 432, %s5026_s13  ;;  %191 = vst [vmem:[#allocation2 + $0x18] sm:$0x1] %v190_v44  ;;  %v222_v49 = vsel %vm4202_vm6, 0, %v221_v36  ;;  %vm4456_vm8 = vmand %vm1329_vm7, %vm210_vm4  ;;  %s3569_s28 = sshll.u32 %s5026_s13, 5 }
   0xf   : > { %223 = vst [vmem:[#allocation2 + $0x1c] sm:$0x1] %v222_v49  ;;  %vm4507_vm13 = vmor %vm1598_vm9, %vm1599_vm10  ;;  %s5002_s4 = scalar_lea.vmem %s5014_s3, %s3569_s28 }
  0x10   : > { %s4142_s21 = scalar_lea.vmem %s5011_s0, %s3987_s18  ;;  %vm4529_vm14 = vmor %vm1431_vm11, %vm1432_vm12 }
  0x11   : > { %v3306_v3 = vld [vmem:[%s4142_s21 + $0x1] ss:$2 sm:$0xff]  ;;  %v3307_v4 = vld [vmem:[%s4142_s21 + $0x31] ss:$2 sm:$0xff]  ;;  %v242_v16 = vld [vmem:[%s4142_s21] ss:$2 sm:$0xff] }
  0x12   : > { %v3308_v5 = vld [vmem:[%s4142_s21 + $0x61] ss:$2 sm:$0xff]  ;;  %v278_v6 = vpack.c.bf16 %v3307_v4, %v3306_v3  ;;  %v3309_v7 = vld [vmem:[%s4142_s21 + $0x91] ss:$2 sm:$0xff]  ;;  %v3299_v17 = vld [vmem:[%s4142_s21 + $0x30] ss:$2 sm:$0xff] }
  0x13   : > { %v3310_v8 = vld [vmem:[%s4142_s21 + $0xc1] ss:$2 sm:$0xff]  ;;  %v3311_v9 = vld [vmem:[%s4142_s21 + $0xf1] ss:$2 sm:$0xff]  ;;  %v279_v10 = vpack.c.bf16 %v3309_v7, %v3308_v5  ;;  %v257_v19 = vpack.c.bf16 %v3299_v17, %v242_v16  ;;  %v3300_v20 = vld [vmem:[%s4142_s21 + $0x60] ss:$2 sm:$0xff] }
  0x14   : > { %v280_v12 = vpack.c.bf16 %v3311_v9, %v3310_v8  ;;  %3808 = vmatprep.mubr.msk.bf16.mxu0 %vm284_vm1, %v278_v6  ;;  %v3312_v14 = vld [vmem:[%s4142_s21 + $0x121] ss:$2 sm:$0xff]  ;;  %v3313_v15 = vld [vmem:[%s4142_s21 + $0x151] ss:$2 sm:$0xff]  ;;  %v3301_v21 = vld [vmem:[%s4142_s21 + $0x90] ss:$2 sm:$0xff] }
  0x15   : > { %3809 = vmatmul.mubr.msk.bf16.vlgmr.msra.gmra.mrb[0].mxu0 %vm284_vm1, %v279_v10  ;;  %v281_v18 = vpack.c.bf16 %v3313_v15, %v3312_v14  ;;  %v3302_v22 = vld [vmem:[%s4142_s21 + $0xc0] ss:$2 sm:$0xff]  ;;  %v3303_v23 = vld [vmem:[%s4142_s21 + $0xf0] ss:$2 sm:$0xff]  ;;  %v258_v24 = vpack.c.bf16 %v3301_v21, %v3300_v20  ;;  %v3349_v6 = vld [vmem:[%s4142_s21 + $0x19] ss:$2 sm:$0xff] }
  0x16   : > { %3817 = vmatpush3.bf16.msra.mxu0 %v379_v11  ;;  %3812 = vmatprep.mubr.msk.bf16.mxu0 %vm284_vm1, %v280_v12  ;;  %v259_v25 = vpack.c.bf16 %v3303_v23, %v3302_v22  ;;  %v3304_v28 = vld [vmem:[%s4142_s21 + $0x120] ss:$2 sm:$0xff]  ;;  %v3305_v29 = vld [vmem:[%s4142_s21 + $0x150] ss:$2 sm:$0xff]  ;;  %v3350_v7 = vld [vmem:[%s4142_s21 + $0x49] ss:$2 sm:$0xff] }
  0x17   : > { %3980 = vmatprep.subr.msk.bf16.mxu0 %vm297_vm0, %v3331_v13  ;;  %v3323_v30 = vld [vmem:[%s4142_s21 + $0x2] ss:$2 sm:$0xff]  ;;  %v3324_v31 = vld [vmem:[%s4142_s21 + $0x32] ss:$2 sm:$0xff]  ;;  %v260_v34 = vpack.c.bf16 %v3305_v29, %v3304_v28  ;;  %v682_v9 = vpack.c.bf16 %v3350_v7, %v3349_v6  ;;  %v3351_v10 = vld [vmem:[%s4142_s21 + $0x79] ss:$2 sm:$0xff] }
  0x18   : > { %v462_v37 = vpack.c.bf16 %v3324_v31, %v3323_v30  ;;  %v3325_v41 = vld [vmem:[%s4142_s21 + $0x62] ss:$2 sm:$0xff]  ;;  %v3326_v42 = vld [vmem:[%s4142_s21 + $0x92] ss:$2 sm:$0xff]  ;;  %v3352_v11 = vld [vmem:[%s4142_s21 + $0xa9] ss:$2 sm:$0xff] }
  0x19   : > { %v3327_v46 = vld [vmem:[%s4142_s21 + $0xc2] ss:$2 sm:$0xff]  ;;  %v3328_v47 = vld [vmem:[%s4142_s21 + $0xf2] ss:$2 sm:$0xff]  ;;  %v463_v50 = vpack.c.bf16 %v3326_v42, %v3325_v41  ;;  %v3353_v12 = vld [vmem:[%s4142_s21 + $0xd9] ss:$2 sm:$0xff]  ;;  %v683_v14 = vpack.c.bf16 %v3352_v11, %v3351_v10 }
  0x1a   : > { %v212_v51 = vld [vmem:[#allocation2 + $0x4] sm:$0x1]  ;;  %v239_v52 = vld [vmem:[#allocation2 + $0x4c] sm:$0x1]  ;;  %v464_v53 = vpack.c.bf16 %v3328_v47, %v3327_v46  ;;  %v3330_v57 = vld [vmem:[%s4142_s21 + $0x152] ss:$2 sm:$0xff] }
  0x1b   : > { %v213_v54 = vsel %vm4202_vm6, 0, %v212_v51  ;;  %v240_v55 = vsel %vm4202_vm6, 0, %v239_v52  ;;  %v3329_v56 = vld [vmem:[%s4142_s21 + $0x122] ss:$2 sm:$0xff]  ;;  %v3354_v13 = vld [vmem:[%s4142_s21 + $0x109] ss:$2 sm:$0xff] }
  0x1c   : > { %214 = vst [vmem:[#allocation2 + $0x4] sm:$0x1] %v213_v54  ;;  %241 = vst [vmem:[#allocation2 + $0x4c] sm:$0x1] %v240_v55  ;;  %v3336_v58 = vld [vmem:[%s4142_s21 + $0x18] ss:$2 sm:$0xff]  ;;  %v465_v60 = vpack.c.bf16 %v3330_v57, %v3329_v56  ;;  %v684_v15 = vpack.c.bf16 %v3354_v13, %v3353_v12 }
  0x1d   : > { %3813 = vmatmul.mubr.msk.bf16.gmra.mrb[4].mxu0 %vm284_vm1, %v281_v18  ;;  %v3337_v59 = vld [vmem:[%s4142_s21 + $0x48] ss:$2 sm:$0xff]  ;;  %v3338_v62 = vld [vmem:[%s4142_s21 + $0x78] ss:$2 sm:$0xff]  ;;  %v3355_v17 = vld [vmem:[%s4142_s21 + $0x139] ss:$2 sm:$0xff] }
  0x1e   : > { %3818 = vmatprep.mubr.msk.bf16.mxu0 %vm284_vm1, %v257_v19  ;;  %v572_v61 = vpack.c.bf16 %v3337_v59, %v3336_v58  ;;  %v3339_v63 = vld [vmem:[%s4142_s21 + $0xa8] ss:$2 sm:$0xff]  ;;  %v3340_v0 = vld [vmem:[%s4142_s21 + $0xd8] ss:$2 sm:$0xff]  ;;  %v3356_v18 = vld [vmem:[%s4142_s21 + $0x169] ss:$2 sm:$0xff] }
  0x1f   : > { %v3341_v1 = vld [vmem:[%s4142_s21 + $0x108] ss:$2 sm:$0xff]  ;;  %v573_v2 = vpack.c.bf16 %v3339_v63, %v3338_v62  ;;  %v3342_v4 = vld [vmem:[%s4142_s21 + $0x138] ss:$2 sm:$0xff]  ;;  %v685_v21 = vpack.c.bf16 %v3356_v18, %v3355_v17  ;;  %v3389_v51 = vld [vmem:[%s4142_s21 + $0x61] ss:$2 sm:$0xff] }
  0x20   : > { %v574_v3 = vpack.c.bf16 %v3341_v1, %v3340_v0  ;;  %v3343_v5 = vld [vmem:[%s4142_s21 + $0x168] ss:$2 sm:$0xff]  ;;  %v3390_v54 = vld [vmem:[%s4142_s21 + $0x91] ss:$2 sm:$0xff]  ;;  %v3391_v55 = vld [vmem:[%s4142_s21 + $0xc1] ss:$2 sm:$0xff] }
  0x21   : > { %v575_v8 = vpack.c.bf16 %v3343_v5, %v3342_v4  ;;  %v3383_v16 = vld [vmem:[%s5012_s1 + $0xc] sm:$0x3]  ;;  %v3362_v19 = vld [vmem:[%s4142_s21 + $0x1a] ss:$2 sm:$0xff]  ;;  %v3396_v30 = vld [vmem:[%s5012_s1 + $0xe] sm:$0x3]  ;;  %v1013_v58 = vpack.c.bf16 %v3391_v55, %v3390_v54 }
  0x22   : > { %v3363_v20 = vld [vmem:[%s4142_s21 + $0x4a] ss:$2 sm:$0xff]  ;;  %v3364_v23 = vld [vmem:[%s4142_s21 + $0x7a] ss:$2 sm:$0xff]  ;;  %v921_v29 = vsel %vm297_vm0, %v3383_v16, 0  ;;  %v1031_v46 = vsel %vm297_vm0, %v3396_v30, 0 }
  0x23   : > { %v792_v22 = vpack.c.bf16 %v3363_v20, %v3362_v19  ;;  %v3368_v31 = vld [vmem:[%s4142_s21 + $0x13a] ss:$2 sm:$0xff]  ;;  %v3409_v47 = vld [vmem:[%s5012_s1 + $0x10] sm:$0x3]  ;;  %v3393_v57 = vld [vmem:[%s4142_s21 + $0x121] ss:$2 sm:$0xff] }
  0x24   : > { %v3379_v41 = vld [vmem:[%s4142_s21 + $0xf0] ss:$2 sm:$0xff]  ;;  %v3380_v42 = vld [vmem:[%s4142_s21 + $0x120] ss:$2 sm:$0xff]  ;;  %v3392_v56 = vld [vmem:[%s4142_s21 + $0xf1] ss:$2 sm:$0xff] }
  0x25   : > { %3819 = vmatmul.mubr.msk.bf16.vlgmr.msra.gmra.mrb[0].mxu0 %vm284_vm1, %v258_v24  ;;  %v3365_v24 = vld [vmem:[%s4142_s21 + $0xaa] ss:$2 sm:$0xff]  ;;  %v904_v44 = vpack.c.bf16 %v3380_v42, %v3379_v41  ;;  %v1014_v59 = vpack.c.bf16 %v3393_v57, %v3392_v56  ;;  %v3395_v62 = vld [vmem:[%s4142_s21 + $0x181] ss:$2 sm:$0xff]  ;;  %v183_v17 = vld [vmem:[#allocation2 + $0x8] sm:$0x1] }
  0x26   : > { %3827 = vmatpush3.bf16.msra.mxu0 %v481_v26  ;;  %3822 = vmatprep.mubr.msk.bf16.mxu0 %vm284_vm1, %v259_v25  ;;  %v3366_v25 = vld [vmem:[%s4142_s21 + $0xda] ss:$2 sm:$0xff]  ;;  %v3367_v26 = vld [vmem:[%s4142_s21 + $0x10a] ss:$2 sm:$0xff]  ;;  %v184_v19 = vsel %vm4191_vm5, 0, %v183_v17 }
  0x27   : > { %3981 = vmatprep.subr.msk.bf16.mxu0 %vm297_vm0, %v3344_v27  ;;  %v793_v27 = vpack.c.bf16 %v3365_v24, %v3364_v23  ;;  %v794_v28 = vpack.c.bf16 %v3367_v26, %v3366_v25  ;;  %v3382_v49 = vld [vmem:[%s4142_s21 + $0x180] ss:$2 sm:$0xff]  ;;  %185 = vst [vmem:[#allocation2 + $0x8] sm:$0x1] %v184_v19  ;;  %v186_v25 = vld [vmem:[#allocation2 + $0x10] sm:$0x1] }
  0x28   : > { %v3401_v63 = vld [vmem:[%s4142_s21 + $0x32] ss:$2 sm:$0xff]  ;;  %v3402_v0 = vld [vmem:[%s4142_s21 + $0x62] ss:$2 sm:$0xff] }
  0x29   : > { %v3404_v4 = vld [vmem:[%s4142_s21 + $0xc2] ss:$2 sm:$0xff]  ;;  %v3405_v5 = vld [vmem:[%s4142_s21 + $0xf2] ss:$2 sm:$0xff] }
  0x2a   : > { %v3406_v6 = vld [vmem:[%s4142_s21 + $0x122] ss:$2 sm:$0xff]  ;;  %v218_v26 = vld [vmem:[#allocation2 + $0x14] sm:$0x1]  ;;  %v4009_v54 = vld [vmem:[%s5013_s2 + $0x18] sm:$0xff]  }
  0x2b   : > { %v3408_v10 = vld [vmem:[%s4142_s21 + $0x182] ss:$2 sm:$0xff] }
  0x2c   : > { %v3997_v12 = vld [vmem:[%s5013_s2 + $0x200] sm:$0xff]   ;;  %v3998_v13 = vld [vmem:[%s5013_s2 + $0x208] sm:$0xff]  }
  0x2d   : > { %3823 = vmatmul.mubr.msk.bf16.gmra.mrb[4].mxu0 %vm284_vm1, %v260_v34  ;;  %v3376_v34 = vld [vmem:[%s4142_s21 + $0x60] ss:$2 sm:$0xff] }
  0x2e   : > { %3828 = vmatprep.mubr.msk.bf16.mxu0 %vm284_vm1, %v462_v37  ;;  %v3377_v37 = vld [vmem:[%s4142_s21 + $0x90] ss:$2 sm:$0xff]  ;;  %v215_v18 = vld [vmem:[#allocation2 + $0xc] sm:$0x1]  ;;  %v4007_v42 = vld [vmem:[%s5013_s2 + $0x220] sm:$0xff]  }
  0x2f   : > { %v216_v20 = vsel %vm4202_vm6, 0, %v215_v18  ;;  %v4010_v55 = vld [vmem:[%s5013_s2 + $0x228] sm:$0xff]   ;;  %v4011_v57 = vld [vmem:[%s5013_s2 + $0x60] sm:$0xff]  }
  0x30   : > { %217 = vst [vmem:[#allocation2 + $0xc] sm:$0x1] %v216_v20  ;;  %v1416_v17 = vld [vmem:[#allocation2 + $0x4] sm:$0x1] }
  0x35   : > { %3829 = vmatmul.mubr.msk.bf16.vlgmr.msra.gmra.mrb[0].mxu0 %vm284_vm1, %v463_v50  ;;  %v3388_v50 = vld [vmem:[%s4142_s21 + $0x31] ss:$2 sm:$0xff] }
  0x36   : > { %3837 = vmatpush3.bf16.msra.mxu0 %v591_v39  ;;  %3832 = vmatprep.mubr.msk.bf16.mxu0 %vm284_vm1, %v464_v53  ;;  %v3378_v39 = vld [vmem:[%s4142_s21 + $0xc0] ss:$2 sm:$0xff]  ;;  %v1012_v53 = vpack.c.bf16 %v3389_v51, %v3388_v50  ;;  %v198_v50 = vld [vmem:[#allocation2 + $0x30] sm:$0x1]  ;;  %v4008_v51 = vld [vmem:[%s5013_s2 + $0x58] sm:$0xff]  }
  0x37   : > { %3982 = vmatprep.subr.msk.bf16.mxu0 %vm297_vm0, %v3357_v32  ;;  %v3369_v32 = vld [vmem:[%s4142_s21 + $0x16a] ss:$2 sm:$0xff] }
  0x38   : > { %v795_v35 = vpack.c.bf16 %v3369_v32, %v3368_v31  ;;  %v4004_v31 = vld [vmem:[%s5013_s2 + $0x218] sm:$0xff]  }
  0x39   : > { %v201_v32 = vld [vmem:[#allocation2 + $0x38] sm:$0x1] }
  0x3d   : > { %3833 = vmatmul.mubr.msk.bf16.gmra.mrb[4].mxu0 %vm284_vm1, %v465_v60  ;;  %v1141_v60 = vsel %vm297_vm0, %v3409_v47, 0 }
  0x3e   : > { %3838 = vmatprep.mubr.msk.bf16.mxu0 %vm284_vm1, %v572_v61  ;;  %v3394_v61 = vld [vmem:[%s4142_s21 + $0x151] ss:$2 sm:$0xff] }
  0x3f   : > { %v1015_v1 = vpack.c.bf16 %v3395_v62, %v3394_v61  ;;  %v3482_v61 = vld [vmem:[%s4142_s21 + $0x19] ss:$2 sm:$0xff]  ;;  %v3483_v62 = vld [vmem:[%s4142_s21 + $0x49] ss:$2 sm:$0xff] }
  0x45   : > { %3839 = vmatmul.mubr.msk.bf16.vlgmr.msra.gmra.mrb[0].mxu0 %vm284_vm1, %v573_v2  ;;  %v1122_v2 = vpack.c.bf16 %v3402_v0, %v3401_v63  ;;  %v2198_v63 = vpack.c.bf16 %v3483_v62, %v3482_v61  ;;  %v4014_v0 = vld [vmem:[%s5013_s2 + $0x68] sm:$0xff]  }
  0x46   : > { %3847 = vmatpush3.bf16.msra.mxu0 %v701_v43  ;;  %3842 = vmatprep.mubr.msk.bf16.mxu0 %vm284_vm1, %v574_v3  ;;  %v903_v43 = vpack.c.bf16 %v3378_v39, %v3377_v37  ;;  %v3403_v3 = vld [vmem:[%s4142_s21 + $0x92] ss:$2 sm:$0xff]  ;;  %v195_v39 = vld [vmem:[#allocation2 + $0x28] sm:$0x1] }
  0x47   : > { %3983 = vmatprep.subr.msk.bf16.mxu0 %vm297_vm0, %v3370_v33  ;;  %v3375_v33 = vld [vmem:[%s4142_s21 + $0x30] ss:$2 sm:$0xff]  ;;  %v1123_v7 = vpack.c.bf16 %v3404_v4, %v3403_v3  ;;  %v196_v41 = vsel %vm4191_vm5, 0, %v195_v39  ;;  %2202 = vst.msk [vmem:[#allocation3 + $0x48] sm:$0xff] %vm284_vm1, %v2198_v63 }
  0x48   : > { %v902_v36 = vpack.c.bf16 %v3376_v34, %v3375_v33  ;;  %v4005_v33 = vld [vmem:[%s5013_s2 + $0x50] sm:$0xff]   ;;  %v202_v34 = vsel %vm4191_vm5, 0, %v201_v32  ;;  %197 = vst [vmem:[#allocation2 + $0x28] sm:$0x1] %v196_v41 }
  0x49   : > { %203 = vst [vmem:[#allocation2 + $0x38] sm:$0x1] %v202_v34  ;;  %v4006_v37 = vld [vmem:[%s5013_s2 + $0x10] sm:$0xff]   ;;  %v4019_v4 = vld [vmem:[%s5013_s2 + $0x240] ss:$0 sps:$4 sm:$0x33]  }
  0x4a   : > { %v4017_v3 = vld [vmem:[%s5013_s2 + $0x70] sm:$0xff]  }
  0x4d   : > { %3843 = vmatmul.mubr.msk.bf16.gmra.mrb[4].mxu0 %vm284_vm1, %v575_v8  ;;  %v1124_v8 = vpack.c.bf16 %v3406_v6, %v3405_v5  ;;  %v4018_v5 = vld [vmem:[%s5013_s2 + $0x30] sm:$0xff]   ;;  %v4020_v6 = vld [vmem:[%s5013_s2 + $0x78] sm:$0xff]  }
  0x4e   : > { %3848 = vmatprep.mubr.msk.bf16.mxu0 %vm284_vm1, %v682_v9  ;;  %v3407_v9 = vld [vmem:[%s4142_s21 + $0x152] ss:$2 sm:$0xff] }
  0x4f   : > { %v1125_v11 = vpack.c.bf16 %v3408_v10, %v3407_v9  ;;  %v4021_v9 = vld [vmem:[%s5013_s2 + $0x38] sm:$0xff]   ;;  %v4022_v10 = vld [vmem:[%s5013_s2 + $0xc0] sm:$0xff]  }
  0x55   : > { %3849 = vmatmul.mubr.msk.bf16.vlgmr.msra.gmra.mrb[0].mxu0 %vm284_vm1, %v683_v14  ;;  %v3999_v14 = vld [vmem:[%s5013_s2 + $0x40] sm:$0xff]  }
  0x56   : > { %3857 = vmatpush3.bf16.msra.mxu0 %v811_v48  ;;  %3852 = vmatprep.mubr.msk.bf16.mxu0 %vm284_vm1, %v684_v15  ;;  %v3381_v48 = vld [vmem:[%s4142_s21 + $0x150] ss:$2 sm:$0xff]  ;;  %v4000_v15 = vld [vmem:[%s5013_s2] sm:$0xff]  }
  0x57   : > { %3984 = vmatprep.subr.msk.bf16.mxu0 %vm297_vm0, %v3383_v16  ;;  %v905_v52 = vpack.c.bf16 %v3382_v49, %v3381_v48  ;;  %v4001_v16 = vld [vmem:[%s5013_s2 + $0x210] sm:$0xff]   ;;  %3646 = vmatprep.subr.bf16.mxu1 %v3999_v14 }
  0x58   : > { %3647 = vmatpush3.bf16.msra.mxu1 %v4000_v15 }
  0x5d   : > { %3853 = vmatmul.mubr.msk.bf16.gmra.mrb[4].mxu0 %vm284_vm1, %v685_v21  ;;  %v192_v21 = vld [vmem:[#allocation2 + $0x20] sm:$0x1] }
  0x5e   : > { %3858 = vmatprep.mubr.msk.bf16.mxu0 %vm284_vm1, %v792_v22  ;;  %v224_v22 = vld [vmem:[#allocation2 + $0x24] sm:$0x1]  ;;  %v193_v23 = vsel %vm4191_vm5, 0, %v192_v21 }
  0x5f   : > { %v225_v24 = vsel %vm4202_vm6, 0, %v224_v22  ;;  %194 = vst [vmem:[#allocation2 + $0x20] sm:$0x1] %v193_v23  ;;  %v1444_v23 = vshll.u32 %v1416_v17, 16 }
  0x60   : > { %226 = vst [vmem:[#allocation2 + $0x24] sm:$0x1] %v225_v24 }
  0x61   : > { %v4446_v39 = vrot.slane %v1444_v23, 5  ;;  %v4468_v23 = vld [vmem:[#allocation2 + $0x4] sm:$0x1] }
  0x65   : > { %3859 = vmatmul.mubr.msk.bf16.vlgmr.msra.gmra.mrb[0].mxu0 %vm284_vm1, %v793_v27  ;;  %v187_v27 = vsel %vm4191_vm5, 0, %v186_v25 }
  0x66   : > { %3867 = vmatpush3.bf16.msra.mxu0 %v921_v29  ;;  %3862 = vmatprep.mubr.msk.bf16.mxu0 %vm284_vm1, %v794_v28  ;;  %v219_v28 = vsel %vm4202_vm6, 0, %v218_v26  ;;  %v4002_v29 = vld [vmem:[%s5013_s2 + $0x48] sm:$0xff]   ;;  %188 = vst [vmem:[#allocation2 + $0x10] sm:$0x1] %v187_v27 }
  0x67   : > { %3985 = vmatprep.subr.msk.bf16.mxu0 %vm297_vm0, %v3396_v30  ;;  %220 = vst [vmem:[#allocation2 + $0x14] sm:$0x1] %v219_v28  ;;  %v4003_v30 = vld [vmem:[%s5013_s2 + $0x8] sm:$0xff]   ;;  %3648 = vmatprep.subr.bf16.mxu1 %v4002_v29  ;;  %v4438_v29 = vld [vmem:[#allocation2] sm:$0xe] }
  0x68   : > { %3649 = vmatpush3.bf16.msra.mxu1 %v4003_v30 }
  0x69   : > { %3650 = vmatprep.subr.bf16.mxu1 %v4005_v33 }
  0x6c   : > { %3651 = vmatpush3.bf16.msra.mxu1 %v4006_v37 }
  0x6d   : > { %3863 = vmatmul.mubr.msk.bf16.gmra.mrb[4].mxu0 %vm284_vm1, %v795_v35  ;;  %v233_v35 = vld [vmem:[#allocation2 + $0x3c] sm:$0x1]  ;;  %3652 = vmatprep.subr.bf16.mxu1 %v4008_v51 }
  0x6e   : > { %3868 = vmatprep.mubr.msk.bf16.mxu0 %vm284_vm1, %v902_v36  ;;  %v234_v36 = vsel %vm4202_vm6, 0, %v233_v35  ;;  %v4444_v35 = vld [vmem:[#allocation2 + $0x4c] sm:$0x1]  ;;  %v1340_v17 = vld [vmem:[#allocation2 + $0x14] sm:$0x1] }
  0x6f   : > { %235 = vst [vmem:[#allocation2 + $0x3c] sm:$0x1] %v234_v36  ;;  %v2082_v51 = vshll.u32 %v4444_v35, 16 }
  0x70   : > { %3653 = vmatpush3.bf16.msra.mxu1 %v4009_v54 }
  0x71   : > { %3654 = vmatprep.subr.bf16.mxu1 %v4011_v57 }
  0x75   : > { %3869 = vmatmul.mubr.msk.bf16.vlgmr.msra.gmra.mrb[0].mxu0 %vm284_vm1, %v903_v43  ;;  %v227_v43 = vld [vmem:[#allocation2 + $0x2c] sm:$0x1] }
  0x76   : > { %3877 = vmatpush3.bf16.msra.mxu0 %v1031_v46  ;;  %3872 = vmatprep.mubr.msk.bf16.mxu0 %vm284_vm1, %v904_v44  ;;  %v204_v44 = vld [vmem:[#allocation2 + $0x40] sm:$0x1]  ;;  %v236_v46 = vld [vmem:[#allocation2 + $0x44] sm:$0x1] }
  0x77   : > { %3986 = vmatprep.subr.msk.bf16.mxu0 %vm297_vm0, %v3409_v47  ;;  %v228_v47 = vsel %vm4202_vm6, 0, %v227_v43  ;;  %v205_v48 = vsel %vm4191_vm5, 0, %v204_v44  ;;  %v237_v49 = vsel %vm4202_vm6, 0, %v236_v46  ;;  %v3430_v44 = vrot.slane %v4438_v29, 9  ;;  %v1343_v46 = vld [vmem:[#allocation2 + $0x18] sm:$0xf] }
  0x78   : > { %229 = vst [vmem:[#allocation2 + $0x2c] sm:$0x1] %v228_v47  ;;  %206 = vst [vmem:[#allocation2 + $0x40] sm:$0x1] %v205_v48  ;;  %v1346_v47 = vld [vmem:[#allocation2 + $0x1c] sm:$0x1] }
  0x79   : > { %238 = vst [vmem:[#allocation2 + $0x44] sm:$0x1] %v237_v49 }
  0x7d   : > { %3873 = vmatmul.mubr.msk.bf16.gmra.mrb[4].mxu0 %vm284_vm1, %v905_v52  ;;  %v199_v52 = vsel %vm4191_vm5, 0, %v198_v50 }
  0x7e   : > { %3878 = vmatprep.mubr.msk.bf16.mxu0 %vm284_vm1, %v1012_v53  ;;  %v230_v53 = vld [vmem:[#allocation2 + $0x34] sm:$0x1]  ;;  %200 = vst [vmem:[#allocation2 + $0x30] sm:$0x1] %v199_v52 }
  0x7f   : > { %v231_v56 = vsel %vm4202_vm6, 0, %v230_v53 }
  0x80   : > { %232 = vst [vmem:[#allocation2 + $0x34] sm:$0x1] %v231_v56  ;;  %v1334_v56 = vld [vmem:[#allocation2 + $0xc] sm:$0x1] }
  0x85   : > { %3879 = vmatmul.mubr.msk.bf16.vlgmr.msra.gmra.mrb[0].mxu0 %vm284_vm1, %v1013_v58  ;;  %v180_v58 = vld [vmem:[#allocation2] sm:$0x1] }
  0x86   : > { %3887 = vmatpush3.bf16.msra.mxu0 %v1141_v60  ;;  %3882 = vmatprep.mubr.msk.bf16.mxu0 %vm284_vm1, %v1014_v59  ;;  %v4012_v59 = vld [vmem:[%s5013_s2 + $0x20] sm:$0xff]   ;;  %v181_v60 = vsel %vm4191_vm5, 0, %v180_v58 }
  0x87   : > { %3101 = vmatprep.subr.bf16.mxu0 %v4098_v38  ;;  %182 = vst [vmem:[#allocation2] sm:$0x1] %v181_v60  ;;  %3655 = vmatpush3.bf16.msra.mxu1 %v4012_v59 }
  0x88   : > { %3656 = vmatprep.subr.bf16.mxu1 %v4014_v0 }
  0x8d   : > { %3883 = vmatmul.mubr.msk.bf16.gmra.mrb[4].mxu0 %vm284_vm1, %v1015_v1  ;;  %v4015_v1 = vld [vmem:[%s5013_s2 + $0x28] sm:$0xff]  }
  0x8e   : > { %3888 = vmatprep.mubr.msk.bf16.mxu0 %vm284_vm1, %v1122_v2  ;;  %v4016_v2 = vld [vmem:[%s5013_s2 + $0x238] sm:$0xff]   ;;  %3657 = vmatpush3.bf16.msra.mxu1 %v4015_v1 }
  0x8f   : > { %3658 = vmatprep.subr.bf16.mxu1 %v4017_v3 }
  0x92   : > { %3659 = vmatpush3.bf16.msra.mxu1 %v4018_v5 }
  0x93   : > { %3660 = vmatprep.subr.bf16.mxu1 %v4020_v6 }
  0x95   : > { %3889 = vmatmul.mubr.msk.bf16.vlgmr.msra.gmra.mrb[0].mxu0 %vm284_vm1, %v1123_v7  ;;  %v4426_v7 = vsel %vm297_vm0, %v4019_v4, 0 }
  0x96   : > { %3892 = vmatprep.mubr.msk.bf16.mxu0 %vm284_vm1, %v1124_v8  ;;  %3102 = vmatpush1.bf16.msra.mxu0 %v3997_v12  ;;  %v2215_v8 = vld [vmem:[#allocation3 + $0x48] sm:$0xff] }
  0x97   : > { %3103 = vmatprep.subr.bf16.mxu0 %v4098_v38  ;;  %3661 = vmatpush3.bf16.msra.mxu1 %v4021_v9 }
  0x98   : > { %3686 = vmatprep.subr.bf16.mxu1 %v4022_v10 }
  0x9a   : > { %3104 = vmatpush1.bf16.msra.mxu0 %v3998_v13  ;;  %v1415_v13 = vld [vmem:[#allocation2] sm:$0xf] }
  0x9b   : > { %3105 = vmatprep.subr.bf16.mxu0 %v4098_v38  ;;  %v1435_v14 = vshrl.u32 %v1415_v13, 16  ;;  %v1438_v15 = vshll.u32 %v1415_v13, 16 }
  0x9d   : > { %3893 = vmatmul.mubr.msk.bf16.gmra.mrb[4].mxu0 %vm284_vm1, %v1125_v11  ;;  %v207_v11 = vld [vmem:[#allocation2 + $0x48] sm:$0x1]  ;;  %v1437_v18 = vrot.slane %v1435_v14, 4  ;;  %v1440_v19 = vrot.slane %v1438_v15, 5 }
  0x9e   : > { %3106 = vmatpush1.bf16.msra.mxu0 %v4001_v16  ;;  %3563 = vmatprep.mubr.msk.bf16.mxu0 %vm284_vm1, %v2215_v8  ;;  %v208_v12 = vsel %vm4191_vm5, 0, %v207_v11  ;;  %v1352_v8 = vld [vmem:[#allocation2 + $0x24] sm:$0x1] }
  0x9f   : > { %3107 = vmatprep.subr.bf16.mxu0 %v4098_v38  ;;  %209 = vst [vmem:[#allocation2 + $0x48] sm:$0x1] %v208_v12  ;;  %v1441_v26 = vor.u32 %v1440_v19, %v1437_v18 }
  0xa1   : > { %v4448_v43 = vrot.slane %v1441_v26, 4 }
  0xa2   : > { %3108 = vmatpush1.bf16.msra.mxu0 %v4004_v31 }
  0xa3   : > { %3109 = vmatprep.subr.bf16.mxu0 %v4098_v38 }
  0xa6   : > { %3110 = vmatpush1.bf16.msra.mxu0 %v4007_v42  ;;  %v1972_v16 = vld [vmem:[#allocation2 + $0x48] sm:$0xf] }
  0xa7   : > { %3111 = vmatprep.subr.bf16.mxu0 %v4098_v38  ;;  %v2073_v20 = vshrl.u32 %v1972_v16, 16  ;;  %v2076_v21 = vshll.u32 %v1972_v16, 16  ;;  %v1337_v16 = vld [vmem:[#allocation2 + $0x10] sm:$0xf] }
  0xa9   : > { %v4440_v30 = vrot.slane %v2073_v20, 4  ;;  %v4442_v31 = vrot.slane %v2076_v21, 5 }
  0xaa   : > { %3112 = vmatpush1.bf16.msra.mxu0 %v4010_v55  ;;  %v1331_v55 = vld [vmem:[#allocation2 + $0x8] sm:$0xf] }
  0xab   : > { %3113 = vmatprep.subr.bf16.mxu0 %v4098_v38  ;;  %v2079_v50 = vor.u32 %v4442_v31, %v4440_v30 }
  0xae   : > { %3114 = vmatpush1.bf16.msra.mxu0 %v4013_v45 }
  0xaf   : > { %3115 = vmatprep.subr.bf16.mxu0 %v4098_v38 }
  0xb2   : > { %3116 = vmatpush1.bf16.msra.mxu0 %v4016_v2  ;;  %v1349_v2 = vld [vmem:[#allocation2 + $0x20] sm:$0xf] }
  0xb3   : > { %3117 = vmatprep.subr.bf16.mxu0 %v4098_v38 }
  0xb6   : > { %3118 = vmatpush1.bf16.msra.mxu0 %v4426_v7 }
 0x168   : > { %v3890_v22 = vpop.f32.mrb[0].mxu0 }
 0x169   : > { %v1218_v24 = vmax.f32 %v3890_v22, 0.0  ;;  %v1177_v25 = vpop.f32.mrb[1].mxu0 }
 0x16a   : > { %v1216_v27 = vmax.f32 %v1177_v25, 0.0  ;;  %v3891_v28 = vpop.f32.mrb[2].mxu0 }
 0x16b   : > { %v3572_v32 = vpack.c.bf16 %v1218_v24, %v1218_v24  ;;  %v1219_v33 = vmax.f32 %v3891_v28, 0.0  ;;  %v1180_v34 = vpop.f32.mrb[3].mxu0  ;;  %v4474_v28 = vld [vmem:[#allocation2 + $0x48] sm:$0xe] }
 0x16c   : > { %v3570_v36 = vpack.c.bf16 %v1216_v27, %v1216_v27  ;;  %v1217_v37 = vmax.f32 %v1180_v34, 0.0 }
 0x16d   : > { %v1265_v41 = vshrl.u32 %v3572_v32, 16  ;;  %v3573_v42 = vpack.c.bf16 %v1219_v33, %v1219_v33  ;;  %v1268_v53 = vshll.u32 %v3572_v32, 16 }
 0x16e   : > { %v1249_v48 = vshrl.u32 %v3570_v36, 16  ;;  %v3571_v49 = vpack.c.bf16 %v1217_v37, %v1217_v37  ;;  %v1252_v54 = vshll.u32 %v3570_v36, 16  ;;  %v1603_v37 = vrot.slane %v4468_v23, 5 }
 0x16f   : > { %v1267_v52 = vrot.slane %v1265_v41, 7  ;;  %v1273_v57 = vshrl.u32 %v3573_v42, 16  ;;  %v1276_v60 = vshll.u32 %v3573_v42, 16  ;;  %v4481_v41 = vrot.slane %v2079_v50, 4  ;;  %v4483_v42 = vld [vmem:[#allocation2 + $0x4c] sm:$0x1] }
 0x170   : > { %v1251_v59 = vrot.slane %v1249_v48, 7  ;;  %v1257_v45 = vshrl.u32 %v3571_v49, 16  ;;  %v1260_v61 = vshll.u32 %v3571_v49, 16  ;;  %v3894_v62 = vpop.f32.mrb[4].mxu0  ;;  %v1358_v50 = vld [vmem:[#allocation2 + $0x2c] sm:$0x1] }
 0x171   : > { %v1270_v63 = vor.u32 %v1268_v53, %v1267_v52  ;;  %v1271_v0 = vrot.slane %v1267_v52, 4  ;;  %v1275_v1 = vrot.slane %v1273_v57, 7  ;;  %v1222_v3 = vmax.f32 %v3894_v62, 0.0  ;;  %v1193_v4 = vpop.f32.mrb[5].mxu0 }
 0x172   : > { %v1254_v5 = vor.u32 %v1252_v54, %v1251_v59  ;;  %v1255_v6 = vrot.slane %v1251_v59, 4  ;;  %v1259_v9 = vrot.slane %v1257_v45, 7  ;;  %v1220_v10 = vmax.f32 %v1193_v4, 0.0  ;;  %v3895_v11 = vpop.f32.mrb[6].mxu0  ;;  %v1355_v59 = vld [vmem:[#allocation2 + $0x28] sm:$0xf] }
 0x173   : > { %v1344_v12 = vsel %vm4456_vm8, %v1270_v63, %v1343_v46  ;;  %v1347_v13 = vsel %vm4191_vm5, %v1271_v0, %v1346_v47  ;;  %v1278_v14 = vor.u32 %v1276_v60, %v1275_v1  ;;  %v1279_v15 = vrot.slane %v1275_v1, 4  ;;  %v1196_v18 = vpop.f32.mrb[7].mxu0  ;;  %v1367_v46 = vld [vmem:[#allocation2 + $0x38] sm:$0xf]  ;;  %v1370_v47 = vld [vmem:[#allocation2 + $0x3c] sm:$0x1] }
 0x174   : > { %1345 = vst [vmem:[#allocation2 + $0x18] sm:$0xf] %v1344_v12  ;;  %1348 = vst [vmem:[#allocation2 + $0x1c] sm:$0x1] %v1347_v13  ;;  %v1332_v19 = vsel %vm4456_vm8, %v1254_v5, %v1331_v55  ;;  %v1335_v20 = vsel %vm4191_vm5, %v1255_v6, %v1334_v56  ;;  %v1262_v21 = vor.u32 %v1260_v61, %v1259_v9  ;;  %v1263_v22 = vrot.slane %v1259_v9, 4 }
 0x175   : > { %1333 = vst [vmem:[#allocation2 + $0x8] sm:$0xf] %v1332_v19  ;;  %1336 = vst [vmem:[#allocation2 + $0xc] sm:$0x1] %v1335_v20  ;;  %v1350_v24 = vsel %vm4456_vm8, %v1278_v14, %v1349_v2  ;;  %v1353_v25 = vsel %vm4191_vm5, %v1279_v15, %v1352_v8  ;;  %v3576_v26 = vpack.c.bf16 %v1222_v3, %v1222_v3  ;;  %v1223_v32 = vmax.f32 %v3895_v11, 0.0 }
 0x176   : > { %v3574_v27 = vpack.c.bf16 %v1220_v10, %v1220_v10  ;;  %1351 = vst [vmem:[#allocation2 + $0x20] sm:$0xf] %v1350_v24  ;;  %1354 = vst [vmem:[#allocation2 + $0x24] sm:$0x1] %v1353_v25  ;;  %v1338_v30 = vsel %vm4456_vm8, %v1262_v21, %v1337_v16  ;;  %v1341_v31 = vsel %vm4191_vm5, %v1263_v22, %v1340_v17  ;;  %v1221_v33 = vmax.f32 %v1196_v18, 0.0 }
 0x177   : > { %1339 = vst [vmem:[#allocation2 + $0x10] sm:$0xf] %v1338_v30  ;;  %1342 = vst [vmem:[#allocation2 + $0x14] sm:$0x1] %v1341_v31  ;;  %v1297_v34 = vshrl.u32 %v3576_v26, 16  ;;  %v3577_v48 = vpack.c.bf16 %v1223_v32, %v1223_v32  ;;  %v4487_v52 = vrot.slane %v2082_v51, 5 }
 0x178   : > { %v1281_v36 = vshrl.u32 %v3574_v27, 16  ;;  %v3575_v49 = vpack.c.bf16 %v1221_v33, %v1221_v33  ;;  %v3477_v53 = vrot.slane %v4474_v28, 9  ;;  %v1300_v55 = vshll.u32 %v3576_v26, 16  ;;  %v1373_v1 = vld [vmem:[#allocation2 + $0x40] sm:$0xf]  ;;  %v4068_v30 = vld [vmem:[%s5013_s2 + $0x1d8] sm:$0xff]  }
 0x179   : > { %v1299_v54 = vrot.slane %v1297_v34, 7  ;;  %v1284_v57 = vshll.u32 %v3574_v27, 16  ;;  %v1305_v60 = vshrl.u32 %v3577_v48, 16  ;;  %v1308_v45 = vshll.u32 %v3577_v48, 16  ;;  %v1376_v2 = vld [vmem:[#allocation2 + $0x44] sm:$0x1] }
 0x17a   : > { %v1283_v56 = vrot.slane %v1281_v36, 7  ;;  %v1289_v61 = vshrl.u32 %v3575_v49, 16  ;;  %v2168_v62 = vrot.slane %v4483_v42, 5  ;;  %v1292_v9 = vshll.u32 %v3575_v49, 16  ;;  %v1361_v10 = vld [vmem:[#allocation2 + $0x30] sm:$0xf] }
 0x17b   : > { %v1302_v63 = vor.u32 %v1300_v55, %v1299_v54  ;;  %v1303_v0 = vrot.slane %v1299_v54, 4  ;;  %v2108_v3 = vld [vmem:[#allocation2 + $0x18] sm:$0xe]  ;;  %v2109_v4 = vld [vmem:[#allocation2 + $0x1c] sm:$0x1]  ;;  %v1307_v6 = vrot.slane %v1305_v60, 7 }
 0x17c   : > { %v1286_v35 = vor.u32 %v1284_v57, %v1283_v56  ;;  %v1287_v51 = vrot.slane %v1283_v56, 4  ;;  %v4491_v5 = vld [vmem:[#allocation2 + $0x8] sm:$0xf]  ;;  %v1291_v8 = vrot.slane %v1289_v61, 7  ;;  %v3471_v11 = vrot.slane %v2108_v3, 9 }
 0x17d   : > { %v1706_v12 = vshrl.u32 %v4491_v5, 16  ;;  %v1368_v13 = vsel %vm4456_vm8, %v1302_v63, %v1367_v46  ;;  %v1371_v14 = vsel %vm4191_vm5, %v1303_v0, %v1370_v47  ;;  %v1364_v15 = vld [vmem:[#allocation2 + $0x34] sm:$0x1]  ;;  %v2144_v16 = vrot.slane %v2109_v4, 5  ;;  %v1417_v17 = vld [vmem:[#allocation2 + $0x8] sm:$0xf] }
 0x17e   : > { %v4498_v18 = vld [vmem:[#allocation2 + $0x10] sm:$0xf]  ;;  %1369 = vst [vmem:[#allocation2 + $0x38] sm:$0xf] %v1368_v13  ;;  %1372 = vst [vmem:[#allocation2 + $0x3c] sm:$0x1] %v1371_v14  ;;  %v1356_v19 = vsel %vm4456_vm8, %v1286_v35, %v1355_v59  ;;  %v1359_v20 = vsel %vm4191_vm5, %v1287_v51, %v1358_v50  ;;  %v1310_v21 = vor.u32 %v1308_v45, %v1307_v6 }
 0x17f   : > { %v1311_v22 = vrot.slane %v1307_v6, 4  ;;  %v2106_v24 = vld [vmem:[#allocation2 + $0x10] sm:$0xe]  ;;  %v1709_v25 = vshll.u32 %v4491_v5, 16  ;;  %1357 = vst [vmem:[#allocation2 + $0x28] sm:$0xf] %v1356_v19  ;;  %v1294_v26 = vor.u32 %v1292_v9, %v1291_v8  ;;  %v2145_v50 = vsel %vm4507_vm13, %v3471_v11, %v2144_v16 }
 0x180   : > { %1360 = vst [vmem:[#allocation2 + $0x2c] sm:$0x1] %v1359_v20  ;;  %v1295_v27 = vrot.slane %v1291_v8, 4  ;;  %v2107_v31 = vld [vmem:[#allocation2 + $0x14] sm:$0x1]  ;;  %v1374_v33 = vsel %vm4456_vm8, %v1310_v21, %v1373_v1  ;;  %v3470_v36 = vrot.slane %v2106_v24, 9  ;;  %v1447_v19 = vsel %vm4529_vm14, %v4448_v43, %v4446_v39 }
 0x181   : > { %v1418_v32 = vld [vmem:[#allocation2 + $0xc] sm:$0x1]  ;;  %v1377_v34 = vsel %vm4191_vm5, %v1311_v22, %v1376_v2  ;;  %v2140_v46 = vrot.slane %v2107_v31, 5  ;;  %v4515_v47 = vld [vmem:[#allocation2] ss:$8 sps:$4 sm:$0xff]   ;;  %v1720_v48 = vshrl.u32 %v4498_v18, 16  ;;  %v1362_v49 = vsel %vm4456_vm8, %v1294_v26, %v1361_v10 }
 0x182   : > { %1375 = vst [vmem:[#allocation2 + $0x40] sm:$0xf] %v1374_v33  ;;  %1378 = vst [vmem:[#allocation2 + $0x44] sm:$0x1] %v1377_v34  ;;  %v1365_v54 = vsel %vm4191_vm5, %v1295_v27, %v1364_v15  ;;  %v1449_v55 = vshrl.u32 %v1417_v17, 16  ;;  %v1452_v60 = vshll.u32 %v1417_v17, 16 }
 0x183   : > { %v1419_v56 = vld [vmem:[#allocation2 + $0x10] sm:$0xf]  ;;  %v1420_v57 = vld [vmem:[#allocation2 + $0x14] sm:$0x1]  ;;  %1363 = vst [vmem:[#allocation2 + $0x30] sm:$0xf] %v1362_v49  ;;  %v2141_v59 = vsel %vm4507_vm13, %v3470_v36, %v2140_v46 }
 0x184   : > { %1366 = vst [vmem:[#allocation2 + $0x34] sm:$0x1] %v1365_v54  ;;  %v1458_v45 = vshll.u32 %v1418_v32, 16  ;;  %v1421_v61 = vld [vmem:[#allocation2 + $0x18] sm:$0xf]  ;;  %v3478_v58 = vcombine.low %v2141_v59, %v2145_v50  ;;  %v1451_v0 = vrot.slane %v1449_v55, 4 }
 0x185   : > { %v1422_v63 = vld [vmem:[#allocation2 + $0x1c] sm:$0x1]  ;;  %v1463_v35 = vshrl.u32 %v1419_v56, 16  ;;  %v1466_v40 = vshll.u32 %v1419_v56, 16  ;;  %v1723_v51 = vshll.u32 %v4498_v18, 16  ;;  %v1454_v2 = vrot.slane %v1452_v60, 5 }
 0x186   : > { %v1472_v3 = vshll.u32 %v1420_v57, 16  ;;  %v1477_v4 = vshrl.u32 %v1421_v61, 16  ;;  %3134 = vmatmul.mubr.bf16.vlgmr.msra.gmra.mrb[8].mxu0 %v3478_v58  ;;  %v1480_v9 = vshll.u32 %v1421_v61, 16  ;;  %v1486_v10 = vshll.u32 %v1422_v63, 16  ;;  %v4533_v11 = vld [vmem:[#allocation2 + $0x10] ss:$8 sps:$4 sm:$0xff]  }
 0x187   : > { %v1465_v6 = vrot.slane %v1463_v35, 4  ;;  %v1468_v8 = vrot.slane %v1466_v40, 5  ;;  %v1455_v13 = vor.u32 %v1454_v2, %v1451_v0  ;;  %v1460_v14 = vrot.slane %v1458_v45, 5  ;;  %v1423_v16 = vld [vmem:[#allocation2 + $0x20] sm:$0xf]  ;;  %v4025_v43 = vld [vmem:[%s5013_s2 + $0xc8] sm:$0xff]  }
 0x188   : > { %v1479_v15 = vrot.slane %v1477_v4, 4  ;;  %v1424_v17 = vld [vmem:[#allocation2 + $0x24] sm:$0x1]  ;;  %v1474_v21 = vrot.slane %v1472_v3, 5  ;;  %v1482_v22 = vrot.slane %v1480_v9, 5  ;;  %v1488_v31 = vrot.slane %v1486_v10, 5 }
 0x189   : > { %v1469_v20 = vor.u32 %v1468_v8, %v1465_v6  ;;  %v1425_v24 = vld [vmem:[#allocation2 + $0x28] sm:$0xf]  ;;  %v1426_v26 = vld [vmem:[#allocation2 + $0x2c] sm:$0x1]  ;;  %v1456_v27 = vrot.slane %v1455_v13, 4  ;;  %v1491_v32 = vshrl.u32 %v1423_v16, 16 }
 0x18a   : > { %v1494_v33 = vshll.u32 %v1423_v16, 16  ;;  %v4024_v34 = vld [vmem:[%s5013_s2 + $0x80] sm:$0xff]   ;;  %v1483_v46 = vor.u32 %v1482_v22, %v1479_v15  ;;  %v1505_v49 = vshrl.u32 %v1425_v24, 16  ;;  %v1508_v54 = vshll.u32 %v1425_v24, 16  ;;  %v1427_v63 = vld [vmem:[#allocation2 + $0x30] sm:$0xf] }
 0x18b   : > { %v1470_v36 = vrot.slane %v1469_v20, 4  ;;  %v1461_v39 = vsel %vm4529_vm14, %v1456_v27, %v1460_v14  ;;  %v1493_v55 = vrot.slane %v1491_v32, 4  ;;  %v1500_v57 = vshll.u32 %v1424_v17, 16  ;;  %v4547_v59 = vld [vmem:[#allocation2 + $0x20] ss:$8 sps:$4 sm:$0xff]   ;;  %v4027_v14 = vld [vmem:[%s5013_s2 + $0xd0] sm:$0xff]  }
 0x18c   : > { %v1496_v56 = vrot.slane %v1494_v33, 5  ;;  %v3426_v50 = vcombine.low %v1447_v19, %v1461_v39  ;;  %v1484_v45 = vrot.slane %v1483_v46, 4  ;;  %v1507_v61 = vrot.slane %v1505_v49, 4  ;;  %v1428_v58 = vld [vmem:[#allocation2 + $0x34] sm:$0x1]  ;;  %v4026_v6 = vld [vmem:[%s5013_s2 + $0x88] sm:$0xff]  }
 0x18d   : > { %v1475_v60 = vsel %vm4529_vm14, %v1470_v36, %v1474_v21  ;;  %v1510_v35 = vrot.slane %v1508_v54, 5  ;;  %v1514_v40 = vshll.u32 %v1426_v26, 16  ;;  %v1429_v2 = vld [vmem:[#allocation2 + $0x38] sm:$0xf]  ;;  %v1430_v3 = vld [vmem:[#allocation2 + $0x3c] sm:$0x1] }
 0x18e   : > { %v1497_v0 = vor.u32 %v1496_v56, %v1493_v55  ;;  %2873 = vmatprep.mubr.bf16.mxu1 %v3426_v50  ;;  %v1489_v4 = vsel %vm4529_vm14, %v1484_v45, %v1488_v31  ;;  %v1519_v8 = vshrl.u32 %v1427_v63, 16  ;;  %v1522_v9 = vshll.u32 %v1427_v63, 16  ;;  %v4560_v19 = vld [vmem:[#allocation2 + $0x30] ss:$8 sps:$4 sm:$0xff]   ;;  %v1568_v49 = vld [vmem:[#allocation2 + $0x8] sm:$0xe] }
 0x18f   : > { %v1528_v10 = vshll.u32 %v1428_v58, 16  ;;  %2874 = vmatmul.mubr.bf16.vlgmr.msra.gmra.mrb[0].mxu1 %v4515_v47  ;;  %v3427_v13 = vcombine.low %v1475_v60, %v1489_v4  ;;  %v1502_v16 = vrot.slane %v1500_v57, 5  ;;  %v1511_v17 = vor.u32 %v1510_v35, %v1507_v61  ;;  %v4029_v32 = vld [vmem:[%s5013_s2 + $0x90] sm:$0xff]   ;;  %v1569_v57 = vld [vmem:[#allocation2 + $0xc] sm:$0x1]  ;;  %v4032_v4 = vld [vmem:[%s5013_s2 + $0xe0] sm:$0xff]  }
 0x190   : > { %v1498_v15 = vrot.slane %v1497_v0, 4  ;;  %3687 = vmatpush3.bf16.msra.mxu1 %v4024_v34  ;;  %v1516_v20 = vrot.slane %v1514_v40, 5  ;;  %v1521_v21 = vrot.slane %v1519_v8, 4  ;;  %v1524_v22 = vrot.slane %v1522_v9, 5  ;;  %v4567_v34 = vld [vmem:[#allocation2 + $0x8] ss:$8 sps:$4 sm:$0xff]  }
 0x191   : > { %v1533_v24 = vshrl.u32 %v1429_v2, 16  ;;  %2881 = vmatprep.mubr.bf16.mxu1 %v3427_v13  ;;  %3688 = vmatprep.subr.bf16.mxu1 %v4025_v43  ;;  %v1512_v26 = vrot.slane %v1511_v17, 4  ;;  %v1530_v27 = vrot.slane %v1528_v10, 5  ;;  %v1536_v47 = vshll.u32 %v1429_v2, 16  ;;  %v4030_v43 = vld [vmem:[%s5013_s2 + $0xd8] sm:$0xff]   ;;  %v4039_v5 = vld [vmem:[%s5013_s2 + $0xb0] sm:$0xff]  }
 0x192   : > { %v1542_v31 = vshll.u32 %v1430_v3, 16  ;;  %v1503_v33 = vsel %vm4529_vm14, %v1498_v15, %v1502_v16  ;;  %v1525_v36 = vor.u32 %v1524_v22, %v1521_v21  ;;  %v4571_v54 = vrot.slane %v1706_v12, 4  ;;  %v4586_v58 = vld [vmem:[#allocation2 + $0x18] ss:$8 sps:$4 sm:$0xff]   ;;  %v1570_v0 = vld [vmem:[#allocation2 + $0x10] sm:$0xe] }
 0x193   : > { %v1535_v46 = vrot.slane %v1533_v24, 4  ;;  %v1517_v39 = vsel %vm4529_vm14, %v1512_v26, %v1516_v20  ;;  %v1538_v55 = vrot.slane %v1536_v47, 5  ;;  %v3431_v50 = vrot.slane %v1568_v49, 9  ;;  %v1571_v35 = vld [vmem:[#allocation2 + $0x14] sm:$0x1]  ;;  %v4031_v40 = vld [vmem:[%s5013_s2 + $0x98] sm:$0xff]  }
 0x194   : > { %v1544_v56 = vrot.slane %v1542_v31, 5  ;;  %3689 = vmatpush3.bf16.msra.mxu1 %v4026_v6  ;;  %v3428_v60 = vcombine.low %v1503_v33, %v1517_v39  ;;  %v1526_v45 = vrot.slane %v1525_v36, 4  ;;  %v4584_v12 = vsel %vm4507_vm13, %v3430_v44, %v1603_v37  ;;  %v1572_v44 = vld [vmem:[#allocation2 + $0x18] sm:$0xe]  ;;  %v1573_v37 = vld [vmem:[#allocation2 + $0x1c] sm:$0x1] }
 0x195   : > { %v1607_v61 = vrot.slane %v1569_v57, 5  ;;  %3690 = vmatprep.subr.bf16.mxu1 %v4027_v14  ;;  %v1539_v63 = vor.u32 %v1538_v55, %v1535_v46  ;;  %v3432_v2 = vrot.slane %v1570_v0, 9  ;;  %v1611_v3 = vrot.slane %v1571_v35, 5  ;;  %v4607_v14 = vld [vmem:[#allocation2 + $0x28] ss:$8 sps:$4 sm:$0xff]   ;;  %v4034_v22 = vld [vmem:[%s5013_s2 + $0xa0] sm:$0xff]  }
 0x196   : > { %v1531_v23 = vsel %vm4529_vm14, %v1526_v45, %v1530_v27  ;;  %v3433_v9 = vrot.slane %v1572_v44, 9  ;;  %v1615_v10 = vrot.slane %v1573_v37, 5  ;;  %v1574_v15 = vld [vmem:[#allocation2 + $0x20] sm:$0xe]  ;;  %v1575_v17 = vld [vmem:[#allocation2 + $0x24] sm:$0x1] }
 0x197   : > { %v4595_v29 = vsel %vm4507_vm13, %v3431_v50, %v1607_v61  ;;  %2882 = vmatmul.mubr.bf16.gmra.mrb[4].mxu1 %v4533_v11  ;;  %v1540_v6 = vrot.slane %v1539_v63, 4  ;;  %v4605_v13 = vsel %vm4507_vm13, %v3432_v2, %v1611_v3  ;;  %v1576_v20 = vld [vmem:[#allocation2 + $0x28] sm:$0xe]  ;;  %v1577_v21 = vld [vmem:[#allocation2 + $0x2c] sm:$0x1]  ;;  %v3434_v27 = vrot.slane %v1574_v15, 9 }
 0x198   : > { %v3438_v8 = vcombine.low %v4584_v12, %v4595_v29  ;;  %3691 = vmatpush3.bf16.msra.mxu1 %v4029_v32  ;;  %2889 = vmatprep.mubr.bf16.mxu1 %v3428_v60  ;;  %v4613_v16 = vsel %vm4507_vm13, %v3433_v9, %v1615_v10  ;;  %v1619_v47 = vrot.slane %v1575_v17, 5  ;;  %v3435_v31 = vrot.slane %v1576_v20, 9  ;;  %v4620_v33 = vld [vmem:[#allocation2 + $0x38] ss:$8 sps:$4 sm:$0xff]   ;;  %v1578_v36 = vld [vmem:[#allocation2 + $0x30] sm:$0xe] }
 0x199   : > { %3692 = vmatprep.subr.bf16.mxu1 %v4030_v43  ;;  %v1545_v11 = vsel %vm4529_vm14, %v1540_v6, %v1544_v56  ;;  %v3439_v26 = vcombine.low %v4605_v13, %v4613_v16  ;;  %v1623_v32 = vrot.slane %v1577_v21, 5  ;;  %v1579_v49 = vld [vmem:[#allocation2 + $0x34] sm:$0x1]  ;;  %v1580_v39 = vld [vmem:[#allocation2 + $0x38] sm:$0xe]  ;;  %v4035_v55 = vld [vmem:[%s5013_s2 + $0xe8] sm:$0xff]  }
 0x19a   : > { %v3429_v24 = vcombine.low %v1531_v23, %v1545_v11  ;;  %v4624_v46 = vsel %vm4507_vm13, %v3434_v27, %v1619_v47  ;;  %v1581_v43 = vld [vmem:[#allocation2 + $0x3c] sm:$0x1]  ;;  %v3436_v57 = vrot.slane %v1578_v36, 9  ;;  %v1627_v50 = vrot.slane %v1579_v49, 5  ;;  %v1837_v45 = vld [vmem:[#allocation2 + $0x8] sm:$0xe] }
 0x19b   : > { %v4631_v56 = vsel %vm4507_vm13, %v3435_v31, %v1623_v32  ;;  %v3437_v60 = vrot.slane %v1580_v39, 9  ;;  %v4036_v61 = vld [vmem:[%s5013_s2 + $0xa8] sm:$0xff]   ;;  %v1631_v0 = vrot.slane %v1581_v43, 5  ;;  %v3450_v23 = vrot.slane %v1837_v45, 9  ;;  %v1840_v37 = vld [vmem:[#allocation2 + $0x14] sm:$0x1] }
 0x19c   : > { %3693 = vmatpush3.bf16.msra.mxu1 %v4031_v40  ;;  %v3440_v63 = vcombine.low %v4624_v46, %v4631_v56  ;;  %v1838_v35 = vld [vmem:[#allocation2 + $0xc] sm:$0x1]  ;;  %v1839_v40 = vld [vmem:[#allocation2 + $0x10] sm:$0xe]  ;;  %v4641_v44 = vsel %vm4507_vm13, %v3436_v57, %v1627_v50  ;;  %v1875_v10 = vrot.slane %v1840_v37, 5  ;;  %v1711_v15 = vrot.slane %v1709_v25, 5 }
 0x19d   : > { %3694 = vmatprep.subr.bf16.mxu1 %v4032_v4  ;;  %v1871_v2 = vrot.slane %v1838_v35, 5  ;;  %v3451_v3 = vrot.slane %v1839_v40, 9  ;;  %v1690_v4 = vld [vmem:[#allocation2 + $0xc] sm:$0x1]  ;;  %v4037_v6 = vld [vmem:[%s5013_s2 + $0xf0] sm:$0xff]   ;;  %v4648_v9 = vsel %vm4507_vm13, %v3437_v60, %v1631_v0  ;;  %v1722_v21 = vrot.slane %v1720_v48, 4 }
 0x19e   : > { %v1715_v11 = vshll.u32 %v1690_v4, 16  ;;  %v3441_v17 = vcombine.low %v4641_v44, %v4648_v9  ;;  %v1842_v27 = vld [vmem:[#allocation2 + $0x1c] sm:$0x1]  ;;  %v1712_v47 = vor.u32 %v1711_v15, %v4571_v54  ;;  %v1843_v36 = vld [vmem:[#allocation2 + $0x20] sm:$0xe]  ;;  %v4048_v29 = vld [vmem:[%s5013_s2 + $0x150] sm:$0xff]  }
 0x19f   : > { %2890 = vmatmul.mubr.bf16.gmra.mrb[8].mxu1 %v4547_v59  ;;  %v1692_v59 = vld [vmem:[#allocation2 + $0x14] sm:$0x1]  ;;  %v4656_v20 = vsel %vm4507_vm13, %v3450_v23, %v1871_v2  ;;  %v4667_v25 = vsel %vm4507_vm13, %v3451_v3, %v1875_v10  ;;  %v1844_v49 = vld [vmem:[#allocation2 + $0x24] sm:$0x1]  ;;  %v1879_v39 = vrot.slane %v1842_v27, 5  ;;  %v3453_v60 = vrot.slane %v1843_v36, 9 }
 0x1a0   : > { %3695 = vmatpush3.bf16.msra.mxu1 %v4034_v22  ;;  %2897 = vmatprep.mubr.bf16.mxu1 %v3429_v24  ;;  %v1725_v22 = vrot.slane %v1723_v51, 5  ;;  %v1841_v24 = vld [vmem:[#allocation2 + $0x18] sm:$0xe]  ;;  %v1717_v31 = vrot.slane %v1715_v11, 5  ;;  %v1729_v32 = vshll.u32 %v1692_v59, 16  ;;  %v3458_v18 = vcombine.low %v4656_v20, %v4667_v25  ;;  %v4065_v42 = vld [vmem:[%s5013_s2 + $0x188] sm:$0xff]  }
 0x1a1   : > { %3696 = vmatprep.subr.bf16.mxu1 %v4035_v55  ;;  %v3452_v51 = vrot.slane %v1841_v24, 9  ;;  %v1693_v43 = vld [vmem:[#allocation2 + $0x18] sm:$0xf]  ;;  %v1694_v55 = vld [vmem:[#allocation2 + $0x1c] sm:$0x1]  ;;  %v1713_v57 = vrot.slane %v1712_v47, 4 }
 0x1a2   : > { %v1726_v48 = vor.u32 %v1725_v22, %v1722_v21  ;;  %v1731_v50 = vrot.slane %v1729_v32, 5  ;;  %v1883_v45 = vrot.slane %v1844_v49, 5  ;;  %v1695_v0 = vld [vmem:[#allocation2 + $0x20] sm:$0xf]  ;;  %v4041_v54 = vld [vmem:[%s5013_s2 + $0xf8] sm:$0xff]   ;;  %v1734_v37 = vshrl.u32 %v1693_v43, 16 }
 0x1a3   : > { %v4677_v40 = vsel %vm4507_vm13, %v3452_v51, %v1879_v39  ;;  %v1696_v23 = vld [vmem:[#allocation2 + $0x24] sm:$0x1]  ;;  %v1737_v2 = vshll.u32 %v1693_v43, 16  ;;  %v1743_v4 = vshll.u32 %v1694_v55, 16  ;;  %v1845_v10 = vld [vmem:[#allocation2 + $0x28] sm:$0xe] }
 0x1a4   : > { %3697 = vmatpush3.bf16.msra.mxu1 %v4036_v61  ;;  %v1727_v35 = vrot.slane %v1726_v48, 4  ;;  %v1718_v61 = vsel %vm4529_vm14, %v1713_v57, %v1717_v31  ;;  %v4683_v3 = vsel %vm4507_vm13, %v3453_v60, %v1883_v45  ;;  %v1846_v59 = vld [vmem:[#allocation2 + $0x2c] sm:$0x1]  ;;  %v1736_v21 = vrot.slane %v1734_v37, 4  ;;  %v1847_v24 = vld [vmem:[#allocation2 + $0x30] sm:$0xe] }
 0x1a5   : > { %3698 = vmatprep.subr.bf16.mxu1 %v4037_v6  ;;  %v1748_v6 = vshrl.u32 %v1695_v0, 16  ;;  %v3459_v11 = vcombine.low %v4677_v40, %v4683_v3  ;;  %v1739_v22 = vrot.slane %v1737_v2, 5  ;;  %v1848_v27 = vld [vmem:[#allocation2 + $0x34] sm:$0x1]  ;;  %v4042_v47 = vld [vmem:[%s5013_s2 + $0xb8] sm:$0xff]   ;;  %v1751_v36 = vshll.u32 %v1695_v0, 16 }
 0x1a6   : > { %v1732_v15 = vsel %vm4529_vm14, %v1727_v35, %v1731_v50  ;;  %v1697_v49 = vld [vmem:[#allocation2 + $0x28] sm:$0xf]  ;;  %v4043_v48 = vld [vmem:[%s5013_s2 + $0x140] sm:$0xff]   ;;  %v1757_v39 = vshll.u32 %v1696_v23, 16  ;;  %v1887_v43 = vrot.slane %v1846_v59, 5  ;;  %v3455_v50 = vrot.slane %v1847_v24, 9 }
 0x1a7   : > { %2898 = vmatmul.mubr.bf16.gmra.mrb[12].mxu1 %v4560_v19  ;;  %v4694_v31 = vcombine.low %v1718_v61, %v1732_v15  ;;  %v1745_v19 = vrot.slane %v1743_v4, 5  ;;  %v1750_v32 = vrot.slane %v1748_v6, 4  ;;  %v1740_v51 = vor.u32 %v1739_v22, %v1736_v21  ;;  %v4044_v55 = vld [vmem:[%s5013_s2 + $0x100] sm:$0xff]   ;;  %v1699_v45 = vld [vmem:[#allocation2 + $0x30] sm:$0xf]  ;;  %v4069_v3 = vld [vmem:[%s5013_s2 + $0x198] sm:$0xff]  }
 0x1a8   : > { %3699 = vmatpush3.bf16.msra.mxu1 %v4039_v5  ;;  %2938 = vmatprep.mubr.bf16.mxu1 %v4567_v34  ;;  %v3454_v5 = vrot.slane %v1845_v10, 9  ;;  %v1698_v34 = vld [vmem:[#allocation2 + $0x2c] sm:$0x1]  ;;  %v1753_v57 = vrot.slane %v1751_v36, 5  ;;  %v1891_v60 = vrot.slane %v1848_v27, 5  ;;  %v1762_v0 = vshrl.u32 %v1697_v49, 16 }
 0x1a9   : > { %3700 = vmatprep.subr.bf16.mxu1 %v4041_v54  ;;  %v4046_v54 = vld [vmem:[%s5013_s2 + $0x148] sm:$0xff]   ;;  %v1741_v35 = vrot.slane %v1740_v51, 4  ;;  %v1759_v37 = vrot.slane %v1757_v39, 5  ;;  %v1700_v2 = vld [vmem:[#allocation2 + $0x34] sm:$0x1]  ;;  %v1765_v61 = vshll.u32 %v1697_v49, 16 }
 0x1aa   : > { %v4707_v23 = vsel %vm4507_vm13, %v3454_v5, %v1887_v43  ;;  %v1754_v4 = vor.u32 %v1753_v57, %v1750_v32  ;;  %v4711_v6 = vsel %vm4507_vm13, %v3455_v50, %v1891_v60  ;;  %v1764_v10 = vrot.slane %v1762_v0, 4  ;;  %v1849_v15 = vld [vmem:[#allocation2 + $0x38] sm:$0xe]  ;;  %v1850_v21 = vld [vmem:[#allocation2 + $0x3c] sm:$0x1]  ;;  %v4047_v60 = vld [vmem:[%s5013_s2 + $0x108] sm:$0xff]  }
 0x1ab   : > { %v1771_v59 = vshll.u32 %v1698_v34, 16  ;;  %v1746_v22 = vsel %vm4529_vm14, %v1741_v35, %v1745_v19  ;;  %v3460_v24 = vcombine.low %v4707_v23, %v4711_v6  ;;  %v1767_v27 = vrot.slane %v1765_v61, 5  ;;  %v1851_v49 = vld [vmem:[#allocation2 + $0x40] sm:$0xe]  ;;  %v1701_v43 = vld [vmem:[#allocation2 + $0x38] sm:$0xf] }
 0x1ac   : > { %3701 = vmatpush3.bf16.msra.mxu1 %v4042_v47  ;;  %v1776_v36 = vshrl.u32 %v1699_v45, 16  ;;  %v1852_v47 = vld [vmem:[#allocation2 + $0x44] sm:$0x1]  ;;  %v1755_v32 = vrot.slane %v1754_v4, 4  ;;  %v1779_v39 = vshll.u32 %v1699_v45, 16  ;;  %v1785_v5 = vshll.u32 %v1700_v2, 16 }
 0x1ad   : > { %3726 = vmatprep.subr.bf16.mxu1 %v4043_v48  ;;  %v1773_v51 = vrot.slane %v1771_v59, 5  ;;  %v1768_v48 = vor.u32 %v1767_v27, %v1764_v10  ;;  %v3456_v57 = vrot.slane %v1849_v15, 9  ;;  %v1895_v19 = vrot.slane %v1850_v21, 5  ;;  %v1702_v50 = vld [vmem:[#allocation2 + $0x3c] sm:$0x1]  ;;  %v4067_v40 = vld [vmem:[%s5013_s2 + $0x190] sm:$0xff]  }
 0x1ae   : > { %v1778_v34 = vrot.slane %v1776_v36, 4  ;;  %v1760_v45 = vsel %vm4529_vm14, %v1755_v32, %v1759_v37  ;;  %v1781_v0 = vrot.slane %v1779_v39, 5  ;;  %v1787_v35 = vrot.slane %v1785_v5, 5  ;;  %v1703_v12 = vld [vmem:[#allocation2 + $0x40] sm:$0xf]  ;;  %v4049_v37 = vld [vmem:[%s5013_s2 + $0x110] sm:$0xff]  }
 0x1af   : > { %2939 = vmatmul.mubr.bf16.vlgmr.msra.gmra.mrb[16].mxu1 %v3438_v8  ;;  %v3457_v2 = vrot.slane %v1851_v49, 9  ;;  %v4729_v8 = vcombine.low %v1746_v22, %v1760_v45  ;;  %v1899_v61 = vrot.slane %v1852_v47, 5  ;;  %v1704_v4 = vld [vmem:[#allocation2 + $0x44] sm:$0x1]  ;;  %v1790_v59 = vshrl.u32 %v1701_v43, 16  ;;  %v4051_v39 = vld [vmem:[%s5013_s2 + $0x158] sm:$0xff]  }
 0x1b0   : > { %3727 = vmatpush3.bf16.msra.mxu1 %v4044_v55  ;;  %2946 = vmatprep.mubr.bf16.mxu1 %v4586_v58  ;;  %v1769_v55 = vrot.slane %v1768_v48, 4  ;;  %v4733_v58 = vsel %vm4507_vm13, %v3456_v57, %v1895_v19  ;;  %v1782_v10 = vor.u32 %v1781_v0, %v1778_v34  ;;  %v1799_v15 = vshll.u32 %v1702_v50, 16  ;;  %v1958_v21 = vld [vmem:[#allocation2 + $0x10] sm:$0xf]  ;;  %v1959_v47 = vld [vmem:[#allocation2 + $0x14] sm:$0x1] }
 0x1b1   : > { %3728 = vmatprep.subr.bf16.mxu1 %v4046_v54  ;;  %v1793_v54 = vshll.u32 %v1701_v43, 16  ;;  %v4742_v27 = vsel %vm4507_vm13, %v3457_v2, %v1899_v61  ;;  %v1804_v36 = vshrl.u32 %v1703_v12, 16  ;;  %v1807_v49 = vshll.u32 %v1703_v12, 16  ;;  %v1960_v32 = vld [vmem:[#allocation2 + $0x18] sm:$0xf]  ;;  %v4072_v23 = vld [vmem:[%s5013_s2 + $0x1e8] sm:$0xff]  }
 0x1b2   : > { %v1774_v22 = vsel %vm4529_vm14, %v1769_v55, %v1773_v51  ;;  %v1783_v5 = vrot.slane %v1782_v10, 4  ;;  %v3461_v43 = vcombine.low %v4733_v58, %v4742_v27  ;;  %v1792_v48 = vrot.slane %v1790_v59, 4  ;;  %v4052_v45 = vld [vmem:[%s5013_s2 + $0x118] sm:$0xff]   ;;  %v1964_v13 = vld [vmem:[#allocation2 + $0x28] sm:$0xf] }
 0x1b3   : > { %v1795_v34 = vrot.slane %v1793_v54, 5  ;;  %v1801_v51 = vrot.slane %v1799_v15, 5  ;;  %v1806_v57 = vrot.slane %v1804_v36, 4  ;;  %v1809_v19 = vrot.slane %v1807_v49, 5  ;;  %v1961_v2 = vld [vmem:[#allocation2 + $0x1c] sm:$0x1] }
 0x1b4   : > { %3729 = vmatpush3.bf16.msra.mxu1 %v4047_v60  ;;  %v1813_v50 = vshll.u32 %v1704_v4, 16  ;;  %v1788_v60 = vsel %vm4529_vm14, %v1783_v5, %v1787_v35  ;;  %v1975_v12 = vshrl.u32 %v1958_v21, 16  ;;  %v1978_v55 = vshll.u32 %v1958_v21, 16  ;;  %v4754_v61 = vld [vmem:[#allocation2 + $0x10] ss:$8 sps:$4 sm:$0xff]   ;;  %v4073_v6 = vld [vmem:[%s5013_s2 + $0x1a8] sm:$0xff]  }
 0x1b5   : > { %3730 = vmatprep.subr.bf16.mxu1 %v4048_v29  ;;  %v1796_v0 = vor.u32 %v1795_v34, %v1792_v48  ;;  %v4053_v29 = vld [vmem:[%s5013_s2 + $0x160] sm:$0xff]   ;;  %v4762_v4 = vcombine.low %v1774_v22, %v1788_v60  ;;  %v1810_v10 = vor.u32 %v1809_v19, %v1806_v57  ;;  %v1984_v54 = vshll.u32 %v1959_v47, 16  ;;  %v1965_v22 = vld [vmem:[#allocation2 + $0x2c] sm:$0x1]  ;;  %v3487_v25 = vld [vmem:[%s4142_s21 + $0x109] ss:$2 sm:$0xff] }
 0x1b6   : > { %v1815_v59 = vrot.slane %v1813_v50, 5  ;;  %v1962_v35 = vld [vmem:[#allocation2 + $0x20] sm:$0xf]  ;;  %v1963_v15 = vld [vmem:[#allocation2 + $0x24] sm:$0x1]  ;;  %v1977_v36 = vrot.slane %v1975_v12, 4 }
 0x1b7   : > { %2947 = vmatmul.mubr.bf16.gmra.mrb[20].mxu1 %v3439_v26  ;;  %v1797_v21 = vrot.slane %v1796_v0, 4  ;;  %v1980_v49 = vrot.slane %v1978_v55, 5  ;;  %v1989_v5 = vshrl.u32 %v1960_v32, 16  ;;  %v1811_v16 = vrot.slane %v1810_v10, 4  ;;  %v4076_v58 = vld [vmem:[%s5013_s2 + $0x1f8] sm:$0xff]  }
 0x1b8   : > { %3731 = vmatpush3.bf16.msra.mxu1 %v4049_v37  ;;  %2954 = vmatprep.mubr.bf16.mxu1 %v4607_v14  ;;  %v1986_v26 = vrot.slane %v1984_v54, 5  ;;  %v1992_v48 = vshll.u32 %v1960_v32, 16  ;;  %v1998_v34 = vshll.u32 %v1961_v2, 16  ;;  %v2003_v50 = vshrl.u32 %v1962_v35, 16  ;;  %v4767_v37 = vld [vmem:[#allocation2 + $0x20] ss:$8 sps:$4 sm:$0xff]  }
 0x1b9   : > { %3732 = vmatprep.subr.bf16.mxu1 %v4051_v39  ;;  %v1802_v57 = vsel %vm4529_vm14, %v1797_v21, %v1801_v51  ;;  %v1981_v47 = vor.u32 %v1980_v49, %v1977_v36  ;;  %v1991_v19 = vrot.slane %v1989_v5, 4  ;;  %v1816_v14 = vsel %vm4529_vm14, %v1811_v16, %v1815_v59  ;;  %v1966_v39 = vld [vmem:[#allocation2 + $0x30] sm:$0xf]  ;;  %v4054_v32 = vld [vmem:[%s5013_s2 + $0x120] sm:$0xff]   ;;  %v4056_v54 = vld [vmem:[%s5013_s2 + $0x168] sm:$0xff]  }
 0x1ba   : > { %v1994_v60 = vrot.slane %v1992_v48, 5  ;;  %v2000_v0 = vrot.slane %v1998_v34, 5  ;;  %v2006_v12 = vshll.u32 %v1962_v35, 16  ;;  %v4774_v2 = vcombine.low %v1802_v57, %v1816_v14  ;;  %v1967_v49 = vld [vmem:[#allocation2 + $0x34] sm:$0x1]  ;;  %v4077_v27 = vld [vmem:[%s5013_s2 + $0x1b8] sm:$0xff]  }
 0x1bb   : > { %v1982_v51 = vrot.slane %v1981_v47, 4  ;;  %v2005_v55 = vrot.slane %v2003_v50, 4  ;;  %v2012_v10 = vshll.u32 %v1963_v15, 16  ;;  %v2017_v36 = vshrl.u32 %v1964_v13, 16  ;;  %v1968_v48 = vld [vmem:[#allocation2 + $0x38] sm:$0xf] }
 0x1bc   : > { %3733 = vmatpush3.bf16.msra.mxu1 %v4052_v45  ;;  %v1995_v59 = vor.u32 %v1994_v60, %v1991_v19  ;;  %v2008_v21 = vrot.slane %v2006_v12, 5  ;;  %v2020_v35 = vshll.u32 %v1964_v13, 16  ;;  %v4057_v45 = vld [vmem:[%s5013_s2 + $0x128] sm:$0xff]   ;;  %v2026_v16 = vshll.u32 %v1965_v22, 16  ;;  %v1969_v15 = vld [vmem:[#allocation2 + $0x3c] sm:$0x1] }
 0x1bd   : > { %3734 = vmatprep.subr.bf16.mxu1 %v4053_v29  ;;  %v1987_v5 = vsel %vm4529_vm14, %v1982_v51, %v1986_v26  ;;  %v2031_v29 = vshrl.u32 %v1966_v39, 16  ;;  %v4058_v13 = vld [vmem:[%s5013_s2 + $0x170] sm:$0xff]   ;;  %v2019_v47 = vrot.slane %v2017_v36, 4  ;;  %v2014_v26 = vrot.slane %v2012_v10, 5  ;;  %v1970_v51 = vld [vmem:[#allocation2 + $0x40] sm:$0xf] }
 0x1be   : > { %v1996_v34 = vrot.slane %v1995_v59, 4  ;;  %v2009_v57 = vor.u32 %v2008_v21, %v2005_v55  ;;  %v2022_v19 = vrot.slane %v2020_v35, 5  ;;  %v2034_v50 = vshll.u32 %v1966_v39, 16  ;;  %v4793_v12 = vld [vmem:[#allocation2 + $0x30] ss:$8 sps:$4 sm:$0xff]  }
 0x1bf   : > { %2955 = vmatmul.mubr.bf16.gmra.mrb[24].mxu1 %v3440_v63  ;;  %v2033_v22 = vrot.slane %v2031_v29, 4  ;;  %v2040_v14 = vshll.u32 %v1967_v49, 16  ;;  %v2045_v60 = vshrl.u32 %v1968_v48, 16  ;;  %v2048_v39 = vshll.u32 %v1968_v48, 16  ;;  %v1971_v59 = vld [vmem:[#allocation2 + $0x44] sm:$0x1] }
 0x1c0   : > { %3735 = vmatpush3.bf16.msra.mxu1 %v4054_v32  ;;  %2962 = vmatprep.mubr.bf16.mxu1 %v4620_v33  ;;  %v2001_v46 = vsel %vm4529_vm14, %v1996_v34, %v2000_v0  ;;  %v2010_v56 = vrot.slane %v2009_v57, 4  ;;  %v2023_v63 = vor.u32 %v2022_v19, %v2019_v47  ;;  %v4059_v32 = vld [vmem:[%s5013_s2 + $0x130] sm:$0xff]   ;;  %v2028_v33 = vrot.slane %v2026_v16, 5  ;;  %v4060_v35 = vld [vmem:[%s5013_s2 + $0x178] sm:$0xff]   ;;  %v4803_v57 = vld [vmem:[#allocation2 + $0x40] ss:$8 sps:$4 sm:$0xff]  }
 0x1c1   : > { %3736 = vmatprep.subr.bf16.mxu1 %v4056_v54  ;;  %v4798_v55 = vcombine.low %v1987_v5, %v2001_v46  ;;  %v2036_v10 = vrot.slane %v2034_v50, 5  ;;  %v2042_v21 = vrot.slane %v2040_v14, 5  ;;  %v2047_v0 = vrot.slane %v2045_v60, 4  ;;  %v3485_v19 = vld [vmem:[%s4142_s21 + $0xa9] ss:$2 sm:$0xff] }
 0x1c2   : > { %v2024_v54 = vrot.slane %v2023_v63, 4  ;;  %v2054_v36 = vshll.u32 %v1969_v15, 16  ;;  %v2050_v29 = vrot.slane %v2048_v39, 5  ;;  %v2059_v34 = vshrl.u32 %v1970_v51, 16  ;;  %v2111_v60 = vld [vmem:[#allocation2 + $0x24] sm:$0x1] }
 0x1c3   : > { %v2037_v49 = vor.u32 %v2036_v10, %v2033_v22  ;;  %v2062_v5 = vshll.u32 %v1970_v51, 16  ;;  %v2015_v16 = vsel %vm4529_vm14, %v2010_v56, %v2014_v26  ;;  %v2068_v15 = vshll.u32 %v1971_v59, 16  ;;  %v4061_v22 = vld [vmem:[%s5013_s2 + $0x138] sm:$0xff]   ;;  %v2113_v10 = vld [vmem:[#allocation2 + $0x2c] sm:$0x1]  ;;  %v4062_v39 = vld [vmem:[%s5013_s2 + $0x1c0] sm:$0xff]  }
 0x1c4   : > { %3737 = vmatpush3.bf16.msra.mxu1 %v4057_v45  ;;  %v2029_v48 = vsel %vm4529_vm14, %v2024_v54, %v2028_v33  ;;  %v2056_v47 = vrot.slane %v2054_v36, 5  ;;  %v3484_v45 = vld [vmem:[%s4142_s21 + $0x79] ss:$2 sm:$0xff]  ;;  %v2051_v46 = vor.u32 %v2050_v29, %v2047_v0  ;;  %v2061_v63 = vrot.slane %v2059_v34, 4  ;;  %v2112_v33 = vld [vmem:[#allocation2 + $0x28] sm:$0xe] }
 0x1c5   : > { %3738 = vmatprep.subr.bf16.mxu1 %v4058_v13  ;;  %v4814_v50 = vcombine.low %v2015_v16, %v2029_v48  ;;  %v2038_v14 = vrot.slane %v2037_v49, 4  ;;  %v2110_v13 = vld [vmem:[#allocation2 + $0x20] sm:$0xe]  ;;  %v2064_v26 = vrot.slane %v2062_v5, 5  ;;  %v2070_v56 = vrot.slane %v2068_v15, 5 }
 0x1c6   : > { %v2199_v51 = vpack.c.bf16 %v3485_v19, %v3484_v45  ;;  %v2052_v44 = vrot.slane %v2051_v46, 4  ;;  %v3472_v9 = vrot.slane %v2110_v13, 9  ;;  %v3486_v54 = vld [vmem:[%s4142_s21 + $0xd9] ss:$2 sm:$0xff]  ;;  %v2152_v20 = vrot.slane %v2113_v10, 5 }
 0x1c7   : > { %2963 = vmatmul.mubr.bf16.gmra.mrb[28].mxu1 %v3441_v17  ;;  %v2043_v59 = vsel %vm4529_vm14, %v2038_v14, %v2042_v21  ;;  %v2148_v17 = vrot.slane %v2111_v60, 5  ;;  %v2065_v0 = vor.u32 %v2064_v26, %v2061_v63  ;;  %v2085_v21 = vsel %vm4529_vm14, %v4481_v41, %v4487_v52  ;;  %v2115_v29 = vld [vmem:[#allocation2 + $0x34] sm:$0x1]  ;;  %v2116_v34 = vld [vmem:[#allocation2 + $0x38] sm:$0xe]  ;;  %v4063_v41 = vld [vmem:[%s5013_s2 + $0x180] sm:$0xff]  }
 0x1c8   : > { %3739 = vmatpush3.bf16.msra.mxu1 %v4059_v32  ;;  %3003 = vmatprep.mubr.bf16.mxu1 %v3458_v18  ;;  %2203 = vst.msk [vmem:[#allocation3 + $0x98] sm:$0xff] %vm284_vm1, %v2199_v51  ;;  %v3473_v32 = vrot.slane %v2112_v33, 9  ;;  %v2114_v18 = vld [vmem:[#allocation2 + $0x30] sm:$0xe]  ;;  %v2057_v36 = vsel %vm4529_vm14, %v2052_v44, %v2056_v47  ;;  %v2200_v49 = vpack.c.bf16 %v3487_v25, %v3486_v54  ;;  %v2117_v5 = vld [vmem:[#allocation2 + $0x3c] sm:$0x1] }
 0x1c9   : > { %3740 = vmatprep.subr.bf16.mxu1 %v4060_v35  ;;  %v4838_v35 = vsel %vm4507_vm13, %v3472_v9, %v2148_v17  ;;  %v4840_v16 = vcombine.low %v2043_v59, %v2057_v36  ;;  %v2066_v48 = vrot.slane %v2065_v0, 4  ;;  %v3474_v47 = vrot.slane %v2114_v18, 9  ;;  %v3488_v45 = vld [vmem:[%s4142_s21 + $0x139] ss:$2 sm:$0xff]  ;;  %v3489_v19 = vld [vmem:[%s4142_s21 + $0x169] ss:$2 sm:$0xff] }
 0x1ca   : > { %v4844_v15 = vsel %vm4507_vm13, %v3473_v32, %v2152_v20  ;;  %2204 = vst.msk [vmem:[#allocation3 + $0xe8] sm:$0xff] %vm284_vm1, %v2200_v49  ;;  %v2156_v14 = vrot.slane %v2115_v29, 5  ;;  %v3475_v46 = vrot.slane %v2116_v34, 9  ;;  %v2160_v63 = vrot.slane %v2117_v5, 5  ;;  %v2118_v13 = vld [vmem:[#allocation2 + $0x40] sm:$0xe] }
 0x1cb   : > { %v3479_v52 = vcombine.low %v4838_v35, %v4844_v15  ;;  %v4064_v60 = vld [vmem:[%s5013_s2 + $0x1c8] sm:$0xff]   ;;  %v2201_v26 = vpack.c.bf16 %v3489_v19, %v3488_v45  ;;  %v2119_v51 = vld [vmem:[#allocation2 + $0x44] sm:$0x1]  ;;  %v3476_v33 = vrot.slane %v2118_v13, 9  ;;  %v4865_v10 = vsel %vm4507_vm13, %v3477_v53, %v2168_v62  ;;  %v4066_v62 = vld [vmem:[%s5013_s2 + $0x1d0] sm:$0xff]  }
 0x1cc   : > { %3741 = vmatpush3.bf16.msra.mxu1 %v4061_v22  ;;  %v2071_v22 = vsel %vm4529_vm14, %v2066_v48, %v2070_v56  ;;  %v4875_v1 = vsel %vm4507_vm13, %v3475_v46, %v2160_v63  ;;  %v2164_v56 = vrot.slane %v2119_v51, 5  ;;  %v4071_v44 = vld [vmem:[%s5013_s2 + $0x1a0] sm:$0xff]   ;;  %v4089_v9 = vld [vmem:[%s5013_s2 + $0x238] sm:$0xff]  }
 0x1cd   : > { %3766 = vmatprep.subr.bf16.mxu1 %v4062_v39  ;;  %v4867_v59 = vcombine.low %v2071_v22, %v2085_v21  ;;  %v4871_v39 = vsel %vm4507_vm13, %v3474_v47, %v2156_v14  ;;  %2205 = vst.msk [vmem:[#allocation3 + $0x138] sm:$0xff] %vm284_vm1, %v2201_v26 }
 0x1ce   : > { %v3480_v28 = vcombine.low %v4871_v39, %v4875_v1  ;;  %v4889_v53 = vsel %vm4507_vm13, %v3476_v33, %v2164_v56 }
 0x1cf   : > { %3004 = vmatmul.mubr.bf16.vlgmr.msra.gmra.mrb[32].mxu1 %v4694_v31  ;;  %v3481_v31 = vcombine.low %v4889_v53, %v4865_v10 }
 0x1d0   : > { %3767 = vmatpush3.bf16.msra.mxu1 %v4063_v41  ;;  %3011 = vmatprep.mubr.bf16.mxu1 %v3459_v11  ;;  %v4070_v11 = vld [vmem:[%s5013_s2 + $0x1e0] sm:$0xff]  }
 0x1d1   : > { %3768 = vmatprep.subr.bf16.mxu1 %v4064_v60  ;;  %v2235_v17 = vld [vmem:[#allocation3 + $0xe8] sm:$0xff] }
 0x1d4   : > { %3769 = vmatpush3.bf16.msra.mxu1 %v4065_v42 }
 0x1d5   : > { %3770 = vmatprep.subr.bf16.mxu1 %v4066_v62 }
 0x1d7   : > { %3012 = vmatmul.mubr.bf16.gmra.mrb[36].mxu1 %v4729_v8  ;;  %v4075_v8 = vld [vmem:[%s5013_s2 + $0x1b0] sm:$0xff]  }
 0x1d8   : > { %3771 = vmatpush3.bf16.msra.mxu1 %v4067_v40  ;;  %3019 = vmatprep.mubr.bf16.mxu1 %v3460_v24  ;;  %v4074_v24 = vld [vmem:[%s5013_s2 + $0x1f0] sm:$0xff]  }
 0x1d9   : > { %3772 = vmatprep.subr.bf16.mxu1 %v4068_v30 }
 0x1dc   : > { %3773 = vmatpush3.bf16.msra.mxu1 %v4069_v3 }
 0x1dd   : > { %3774 = vmatprep.subr.bf16.mxu1 %v4070_v11 }
 0x1df   : > { %3020 = vmatmul.mubr.bf16.gmra.mrb[40].mxu1 %v4762_v4  ;;  %v4083_v4 = vld [vmem:[%s5013_s2 + $0x208] sm:$0xff]  }
 0x1e0   : > { %3775 = vmatpush3.bf16.msra.mxu1 %v4071_v44  ;;  %3027 = vmatprep.mubr.bf16.mxu1 %v3461_v43  ;;  %v4082_v43 = vld [vmem:[%s5013_s2 + $0x200] sm:$0xff]  }
 0x1e1   : > { %3776 = vmatprep.subr.bf16.mxu1 %v4072_v23 }
 0x1e4   : > { %3777 = vmatpush3.bf16.msra.mxu1 %v4073_v6 }
 0x1e5   : > { %3778 = vmatprep.subr.bf16.mxu1 %v4074_v24 }
 0x1e7   : > { %3028 = vmatmul.mubr.bf16.gmra.mrb[44].mxu1 %v4774_v2  ;;  %v4085_v2 = vld [vmem:[%s5013_s2 + $0x218] sm:$0xff]  }
 0x1e8   : > { %3779 = vmatpush3.bf16.msra.mxu1 %v4075_v8  ;;  %3068 = vmatprep.mubr.bf16.mxu1 %v4798_v55  ;;  %v4087_v55 = vld [vmem:[%s5013_s2 + $0x228] sm:$0xff]  }
 0x1e9   : > { %3780 = vmatprep.subr.bf16.mxu1 %v4076_v58 }
 0x1ec   : > { %3781 = vmatpush3.bf16.msra.mxu1 %v4077_v27 }
 0x1ed   : > { %3896 = vmatprep.subr.bf16.mxu1 %v4098_v38 }
 0x1ef   : > { %3069 = vmatmul.mubr.bf16.vlgmr.msra.gmra.mrb[48].mxu1 %v4754_v61  ;;  %v4084_v61 = vld [vmem:[%s5013_s2 + $0x210] sm:$0xff]  }
 0x1f0   : > { %3905 = vmatpush1.bf16.msra.mxu1 %v4082_v43  ;;  %3076 = vmatprep.mubr.bf16.mxu1 %v4814_v50  ;;  %v2225_v50 = vld [vmem:[#allocation3 + $0x98] sm:$0xff] }
 0x1f1   : > { %3897 = vmatprep.subr.bf16.mxu1 %v4098_v38 }
 0x1f4   : > { %3906 = vmatpush1.bf16.msra.mxu1 %v4083_v4 }
 0x1f5   : > { %3898 = vmatprep.subr.bf16.mxu1 %v4098_v38 }
 0x1f7   : > { %3077 = vmatmul.mubr.bf16.gmra.mrb[52].mxu1 %v4767_v37  ;;  %v4086_v37 = vld [vmem:[%s5013_s2 + $0x220] sm:$0xff]  }
 0x1f8   : > { %3907 = vmatpush1.bf16.msra.mxu1 %v4084_v61  ;;  %3084 = vmatprep.mubr.bf16.mxu1 %v4840_v16 }
 0x1f9   : > { %3899 = vmatprep.subr.bf16.mxu1 %v4098_v38 }
 0x1fc   : > { %3908 = vmatpush1.bf16.msra.mxu1 %v4085_v2 }
 0x1fd   : > { %3900 = vmatprep.subr.bf16.mxu1 %v4098_v38 }
 0x1ff   : > { %3085 = vmatmul.mubr.bf16.gmra.mrb[56].mxu1 %v4793_v12  ;;  %v4088_v12 = vld [vmem:[%s5013_s2 + $0x230] sm:$0xff]  }
 0x200   : > { %3909 = vmatpush1.bf16.msra.mxu1 %v4086_v37  ;;  %3092 = vmatprep.mubr.bf16.mxu1 %v4867_v59 }
 0x201   : > { %3901 = vmatprep.subr.bf16.mxu1 %v4098_v38 }
 0x204   : > { %3910 = vmatpush1.bf16.msra.mxu1 %v4087_v55 }
 0x205   : > { %3902 = vmatprep.subr.bf16.mxu1 %v4098_v38 }
 0x207   : > { %3093 = vmatmul.mubr.bf16.gmra.mrb[60].mxu1 %v4803_v57  ;;  %v2245_v57 = vld [vmem:[#allocation3 + $0x138] sm:$0xff] }
 0x208   : > { %3911 = vmatpush1.bf16.msra.mxu1 %v4088_v12  ;;  %3564 = vmatprep.mubr.msk.bf16.mxu1 %vm284_vm1, %v2225_v50 }
 0x209   : > { %3903 = vmatprep.subr.bf16.mxu1 %v4098_v38 }
 0x20c   : > { %3912 = vmatpush1.bf16.msra.mxu1 %v4089_v9 }
 0x20d   : > { %3904 = vmatprep.subr.bf16.mxu1 %v4098_v38 }
 0x210   : > { %3913 = vmatpush1.bf16.msra.mxu1 %v4426_v7 }
 0x213   : > { %3142 = vmatmul.mubr.bf16.vlgmr.msra.gmra.mrb[64].mxu1 %v3479_v52 }
 0x214   : > { %3565 = vmatprep.mubr.msk.bf16.mxu1 %vm284_vm1, %v2235_v17 }
 0x21b   : > { %3150 = vmatmul.mubr.bf16.gmra.mrb[68].mxu1 %v3480_v28 }
 0x21c   : > { %3566 = vmatprep.mubr.msk.bf16.mxu1 %vm284_vm1, %v2245_v57 }
 0x223   : > { %3158 = vmatmul.mubr.bf16.gmra.mrb[72].mxu1 %v3481_v31 }
 0x259   : > { %v4992_v38 = vpop.f32.mrb[8].mxu0 }
 0x25a   : > { %v3137_v7 = vpop.f32.mrb[9].mxu0 }
 0x25b   : > { %v4994_v54 = vpop.f32.mrb[10].mxu0 }
 0x25c   : > { %v3140_v0 = vpop.f32.mrb[11].mxu0 }
 0x262   : > { %v3662_v32 = vpop.f32.mrb[0].mxu1 }
 0x263   : > { %v3663_v20 = vpop.f32.mrb[1].mxu1 }
 0x264   : > { %v3664_v25 = vadd.f32 %v3663_v20, %v3662_v32  ;;  %v3665_v18 = vpop.f32.mrb[2].mxu1 }
 0x265   : > { %v3666_v36 = vpop.f32.mrb[3].mxu1 }
 0x266   : > { %v3667_v21 = vadd.f32 %v3666_v36, %v3665_v18 }
 0x26a   : > { %v3668_v35 = vpop.f32.mrb[4].mxu1 }
 0x26b   : > { %v3669_v49 = vpop.f32.mrb[5].mxu1 }
 0x26c   : > { %v3670_v29 = vadd.f32 %v3669_v49, %v3668_v35  ;;  %v3671_v34 = vpop.f32.mrb[6].mxu1 }
 0x26d   : > { %v3672_v5 = vpop.f32.mrb[7].mxu1 }
 0x26e   : > { %v3673_v16 = vadd.f32 %v3672_v5, %v3671_v34 }
 0x272   : > { %v3674_v48 = vpop.f32.mrb[8].mxu1 }
 0x273   : > { %v3675_v15 = vpop.f32.mrb[9].mxu1 }
 0x274   : > { %v3676_v47 = vadd.f32 %v3675_v15, %v3674_v48  ;;  %v3677_v45 = vpop.f32.mrb[10].mxu1 }
 0x275   : > { %v3678_v19 = vpop.f32.mrb[11].mxu1 }
 0x276   : > { %v3679_v41 = vadd.f32 %v3678_v19, %v3677_v45 }
 0x27a   : > { %v3680_v52 = vpop.f32.mrb[12].mxu1 }
 0x27b   : > { %v3681_v14 = vpop.f32.mrb[13].mxu1 }
 0x27c   : > { %v3682_v46 = vadd.f32 %v3681_v14, %v3680_v52  ;;  %v3683_v63 = vpop.f32.mrb[14].mxu1 }
 0x27d   : > { %v3684_v13 = vpop.f32.mrb[15].mxu1 }
 0x27e   : > { %v3685_v60 = vadd.f32 %v3684_v13, %v3683_v63 }
 0x282   : > { %v3702_v22 = vpop.f32.mrb[16].mxu1 }
 0x283   : > { %v3703_v26 = vpop.f32.mrb[17].mxu1 }
 0x284   : > { %v3704_v51 = vadd.f32 %v3703_v26, %v3702_v22  ;;  %v3705_v33 = vpop.f32.mrb[18].mxu1 }
 0x285   : > { %v3706_v10 = vpop.f32.mrb[19].mxu1 }
 0x286   : > { %v2941_v59 = vadd.f32 %v3704_v51, %v3664_v25  ;;  %v3707_v39 = vadd.f32 %v3706_v10, %v3705_v33 }
 0x288   : > { %v2944_v1 = vadd.f32 %v3707_v39, %v3667_v21 }
 0x28a   : > { %v3708_v56 = vpop.f32.mrb[20].mxu1 }
 0x28b   : > { %v3709_v28 = vpop.f32.mrb[21].mxu1 }
 0x28c   : > { %v3710_v42 = vadd.f32 %v3709_v28, %v3708_v56  ;;  %v3711_v53 = vpop.f32.mrb[22].mxu1 }
 0x28d   : > { %v3712_v62 = vpop.f32.mrb[23].mxu1 }
 0x28e   : > { %v2949_v31 = vadd.f32 %v3710_v42, %v3670_v29  ;;  %v3713_v40 = vadd.f32 %v3712_v62, %v3711_v53 }
 0x290   : > { %v2952_v30 = vadd.f32 %v3713_v40, %v3673_v16 }
 0x292   : > { %v3714_v3 = vpop.f32.mrb[24].mxu1 }
 0x293   : > { %v3715_v11 = vpop.f32.mrb[25].mxu1 }
 0x294   : > { %v3716_v44 = vadd.f32 %v3715_v11, %v3714_v3  ;;  %v3717_v23 = vpop.f32.mrb[26].mxu1 }
 0x295   : > { %v3718_v6 = vpop.f32.mrb[27].mxu1 }
 0x296   : > { %v2957_v24 = vadd.f32 %v3716_v44, %v3676_v47  ;;  %v3719_v8 = vadd.f32 %v3718_v6, %v3717_v23 }
 0x298   : > { %v2960_v58 = vadd.f32 %v3719_v8, %v3679_v41 }
 0x29a   : > { %v3720_v27 = vpop.f32.mrb[28].mxu1 }
 0x29b   : > { %v3721_v43 = vpop.f32.mrb[29].mxu1 }
 0x29c   : > { %v3722_v4 = vadd.f32 %v3721_v43, %v3720_v27  ;;  %v3723_v61 = vpop.f32.mrb[30].mxu1 }
 0x29d   : > { %v3724_v2 = vpop.f32.mrb[31].mxu1 }
 0x29e   : > { %v2965_v37 = vadd.f32 %v3722_v4, %v3682_v46  ;;  %v3725_v55 = vadd.f32 %v3724_v2, %v3723_v61 }
 0x2a0   : > { %v2968_v50 = vadd.f32 %v3725_v55, %v3685_v60 }
 0x2a2   : > { %v3742_v12 = vpop.f32.mrb[32].mxu1 }
 0x2a3   : > { %v3743_v9 = vpop.f32.mrb[33].mxu1 }
 0x2a4   : > { %v3744_v17 = vadd.f32 %v3743_v9, %v3742_v12  ;;  %v3745_v57 = vpop.f32.mrb[34].mxu1 }
 0x2a5   : > { %v3746_v7 = vpop.f32.mrb[35].mxu1 }
 0x2a6   : > { %v3006_v0 = vadd.f32 %v3744_v17, %v2941_v59  ;;  %v3747_v32 = vadd.f32 %v3746_v7, %v3745_v57 }
 0x2a8   : > { %v3009_v20 = vadd.f32 %v3747_v32, %v2944_v1 }
 0x2aa   : > { %v3748_v25 = vpop.f32.mrb[36].mxu1 }
 0x2ab   : > { %v3749_v18 = vpop.f32.mrb[37].mxu1 }
 0x2ac   : > { %v3750_v36 = vadd.f32 %v3749_v18, %v3748_v25  ;;  %v3751_v21 = vpop.f32.mrb[38].mxu1 }
 0x2ad   : > { %v3752_v35 = vpop.f32.mrb[39].mxu1 }
 0x2ae   : > { %v3014_v49 = vadd.f32 %v3750_v36, %v2949_v31  ;;  %v3753_v29 = vadd.f32 %v3752_v35, %v3751_v21 }
 0x2b0   : > { %v3017_v34 = vadd.f32 %v3753_v29, %v2952_v30 }
 0x2b2   : > { %v3754_v5 = vpop.f32.mrb[40].mxu1 }
 0x2b3   : > { %v3755_v16 = vpop.f32.mrb[41].mxu1 }
 0x2b4   : > { %v3756_v48 = vadd.f32 %v3755_v16, %v3754_v5  ;;  %v3757_v15 = vpop.f32.mrb[42].mxu1 }
 0x2b5   : > { %v3758_v47 = vpop.f32.mrb[43].mxu1 }
 0x2b6   : > { %v3022_v45 = vadd.f32 %v3756_v48, %v2957_v24  ;;  %v3759_v19 = vadd.f32 %v3758_v47, %v3757_v15 }
 0x2b8   : > { %v3025_v41 = vadd.f32 %v3759_v19, %v2960_v58 }
 0x2ba   : > { %v3760_v52 = vpop.f32.mrb[44].mxu1 }
 0x2bb   : > { %v3761_v14 = vpop.f32.mrb[45].mxu1 }
 0x2bc   : > { %v3762_v46 = vadd.f32 %v3761_v14, %v3760_v52  ;;  %v3763_v63 = vpop.f32.mrb[46].mxu1 }
 0x2bd   : > { %v3764_v13 = vpop.f32.mrb[47].mxu1 }
 0x2be   : > { %v3030_v60 = vadd.f32 %v3762_v46, %v2965_v37  ;;  %v3765_v22 = vadd.f32 %v3764_v13, %v3763_v63 }
 0x2c0   : > { %v3033_v26 = vadd.f32 %v3765_v22, %v2968_v50 }
 0x2c2   : > { %v3782_v51 = vpop.f32.mrb[48].mxu1 }
 0x2c3   : > { %v3783_v33 = vpop.f32.mrb[49].mxu1 }
 0x2c4   : > { %v3784_v10 = vadd.f32 %v3783_v33, %v3782_v51  ;;  %v3785_v59 = vpop.f32.mrb[50].mxu1 }
 0x2c5   : > { %v3786_v39 = vpop.f32.mrb[51].mxu1 }
 0x2c6   : > { %v3071_v1 = vadd.f32 %v3784_v10, %v3006_v0  ;;  %v3787_v56 = vadd.f32 %v3786_v39, %v3785_v59 }
 0x2c8   : > { %v3136_v28 = vadd.f32 %v4992_v38, %v3071_v1  ;;  %v3074_v42 = vadd.f32 %v3787_v56, %v3009_v20 }
 0x2ca   : > { %v3139_v53 = vadd.f32 %v4994_v54, %v3074_v42  ;;  %v3788_v62 = vpop.f32.mrb[52].mxu1  ;;  %v3166_v40 = vmax.f32 %v3136_v28, 0.0 }
 0x2cb   : > { %v3789_v31 = vpop.f32.mrb[53].mxu1 }
 0x2cc   : > { %v3167_v30 = vmax.f32 %v3139_v53, 0.0  ;;  %v3790_v3 = vadd.f32 %v3789_v31, %v3788_v62  ;;  %v3791_v11 = vpop.f32.mrb[54].mxu1 }
 0x2cd   : > { %v3792_v44 = vpop.f32.mrb[55].mxu1 }
 0x2ce   : > { %v3581_v23 = vpack.c.bf16 %v3167_v30, %v3166_v40  ;;  %v3793_v6 = vadd.f32 %v3792_v44, %v3791_v11  ;;  %v3079_v38 = vadd.f32 %v3790_v3, %v3014_v49 }
 0x2d0   : > { %3582 = vst [vmem:[%s5002_s4] sm:$0xff] %v3581_v23   ;;  %v3082_v24 = vadd.f32 %v3793_v6, %v3017_v34 }
 0x2d2   : > { %v3794_v8 = vpop.f32.mrb[56].mxu1 }
 0x2d3   : > { %v3795_v54 = vpop.f32.mrb[57].mxu1 }
 0x2d4   : > { %v3796_v58 = vadd.f32 %v3795_v54, %v3794_v8  ;;  %v3797_v27 = vpop.f32.mrb[58].mxu1 }
 0x2d5   : > { %v3798_v43 = vpop.f32.mrb[59].mxu1 }
 0x2d6   : > { %v3799_v4 = vadd.f32 %v3798_v43, %v3797_v27  ;;  %v3087_v61 = vadd.f32 %v3796_v58, %v3022_v45 }
 0x2d8   : > { %v3090_v2 = vadd.f32 %v3799_v4, %v3025_v41 }
 0x2da   : > { %v3800_v37 = vpop.f32.mrb[60].mxu1 }
 0x2db   : > { %v3801_v55 = vpop.f32.mrb[61].mxu1 }
 0x2dc   : > { %v3802_v50 = vadd.f32 %v3801_v55, %v3800_v37  ;;  %v3803_v12 = vpop.f32.mrb[62].mxu1 }
 0x2dd   : > { %v3804_v9 = vpop.f32.mrb[63].mxu1 }
 0x2de   : > { %v3805_v17 = vadd.f32 %v3804_v9, %v3803_v12  ;;  %v3095_v57 = vadd.f32 %v3802_v50, %v3030_v60 }
 0x2e0   : > { %v3098_v7 = vadd.f32 %v3805_v17, %v3033_v26 }
 0x2e6   : > { %v3143_v0 = vpop.f32.mrb[64].mxu1 }
 0x2e7   : > { %v3144_v32 = vadd.f32 %v3143_v0, %v3079_v38  ;;  %v3145_v20 = vpop.f32.mrb[65].mxu1 }
 0x2e8   : > { %v3146_v25 = vpop.f32.mrb[66].mxu1 }
 0x2e9   : > { %v3147_v18 = vadd.f32 %v3146_v25, %v3082_v24  ;;  %v3148_v36 = vpop.f32.mrb[67].mxu1  ;;  %v3168_v21 = vmax.f32 %v3144_v32, 0.0 }
 0x2eb   : > { %v3169_v35 = vmax.f32 %v3147_v18, 0.0 }
 0x2ed   : > { %v3586_v49 = vpack.c.bf16 %v3169_v35, %v3168_v21 }
 0x2ee   : > { %v3151_v29 = vpop.f32.mrb[68].mxu1 }
 0x2ef   : > { %3598 = vst [vmem:[%s5002_s4 + $0x8] sm:$0xff] %v3586_v49   ;;  %v3152_v34 = vadd.f32 %v3151_v29, %v3087_v61  ;;  %v3153_v5 = vpop.f32.mrb[69].mxu1 }
 0x2f0   : > { %v3154_v16 = vpop.f32.mrb[70].mxu1 }
 0x2f1   : > { %v3155_v48 = vadd.f32 %v3154_v16, %v3090_v2  ;;  %v3156_v15 = vpop.f32.mrb[71].mxu1  ;;  %v3170_v47 = vmax.f32 %v3152_v34, 0.0 }
 0x2f3   : > { %v3171_v45 = vmax.f32 %v3155_v48, 0.0 }
 0x2f5   : > { %v3591_v19 = vpack.c.bf16 %v3171_v45, %v3170_v47 }
 0x2f6   : > { %v3159_v41 = vpop.f32.mrb[72].mxu1 }
 0x2f7   : > { %3599 = vst [vmem:[%s5002_s4 + $0x10] sm:$0xff] %v3591_v19   ;;  %v3160_v52 = vadd.f32 %v3159_v41, %v3095_v57  ;;  %v3161_v14 = vpop.f32.mrb[73].mxu1 }
 0x2f8   : > { %v3162_v46 = vpop.f32.mrb[74].mxu1 }
 0x2f9   : > { %v3163_v63 = vadd.f32 %v3162_v46, %v3098_v7  ;;  %v3164_v13 = vpop.f32.mrb[75].mxu1  ;;  %v3172_v60 = vmax.f32 %v3160_v52, 0.0 }
 0x2fb   : > { %v3173_v22 = vmax.f32 %v3163_v63, 0.0 }
 0x2fd   : > { %v3596_v26 = vpack.c.bf16 %v3173_v22, %v3172_v60 }
 0x2ff   : > { %3600 = vst [vmem:[%s5002_s4 + $0x18] sm:$0xff] %v3596_v26  }
 0x300 PF: > { %s13_s12 = sadd.s32 1, %s4096_s12  }
 0x301   : > { %p10_p4 = scmp.ge.s32.totalorder %s13_s12, 4  }
 0x303   :  { %12 = sbr.rel (!%p10_p4) target bundleno = 1 (0x1), region = 144 }

</bundles_post_ra>
